<compile_context>
chip_gen: v7x
topology: tpu7x:2x2x1
jax: 0.10.0
libtpu: 0.0.40
codegen_flags: <defaults>
</compile_context>

<pallas_src>
import functools

import jax
import jax.numpy as jnp
from jax.experimental import pallas as pl
from jax.experimental.pallas import tpu as pltpu


# ----------------------------- helpers -------------------------------------

def _round_up(x, m):
    return ((x + m - 1) // m) * m


def _pad2d(x, rows, cols):
    r, c = x.shape
    return jnp.pad(x, ((0, rows - r), (0, cols - c)))


def _pick_tile(n, candidates):
    for c in candidates:
        if n % c == 0:
            return c
    return n


def _epilogue(y, b_ref, *, apply_bias_relu, apply_log_softmax, valid_cols):
    """Shared finalize: optional (+bias, ReLU), optional masked log_softmax."""
    if apply_bias_relu:
        y = jnp.maximum(y + b_ref[...], 0.0)
    if apply_log_softmax:
        ncols = y.shape[-1]
        if valid_cols < ncols:
            # Mask lane-padding columns so they don't pollute max / sum-exp.
            col = jax.lax.broadcasted_iota(jnp.int32, y.shape, 1)
            y = jnp.where(col < valid_cols, y, -1e30)
        m = jnp.max(y, axis=1, keepdims=True)
        z = y - m
        lse = jnp.log(jnp.sum(jnp.exp(z), axis=1, keepdims=True))
        y = z - lse
    return y


# ----------------------------- Pallas kernels -----------------------------

def _agg_kernel(a_ref, h_ref, b_ref, o_ref, acc_ref, *,
                apply_bias_relu, apply_log_softmax, valid_cols):
    """out_tile = epilogue(sum_k A_tile[i,k] @ H_tile[k], b)."""
    k = pl.program_id(1)

    @pl.when(k == 0)
    def _():
        acc_ref[...] = jnp.zeros_like(acc_ref)

    acc_ref[...] += jnp.dot(a_ref[...], h_ref[...],
                            preferred_element_type=jnp.float32)

    @pl.when(k == pl.num_programs(1) - 1)
    def _():
        y = _epilogue(acc_ref[...], b_ref,
                      apply_bias_relu=apply_bias_relu,
                      apply_log_softmax=apply_log_softmax,
                      valid_cols=valid_cols)
        o_ref[...] = y.astype(o_ref.dtype)


def _dense_kernel(x_ref, w_ref, b_ref, o_ref, *,
                  apply_bias_relu, apply_log_softmax, valid_cols):
    """out_tile = epilogue(X_tile @ W, b)  (small feature-transform matmul)."""
    y = jnp.dot(x_ref[...], w_ref[...], preferred_element_type=jnp.float32)
    y = _epilogue(y, b_ref,
                  apply_bias_relu=apply_bias_relu,
                  apply_log_softmax=apply_log_softmax,
                  valid_cols=valid_cols)
    o_ref[...] = y.astype(o_ref.dtype)


# ----------------------------- wrappers -----------------------------------

def agg_matmul(a, h, b, *, apply_bias_relu, apply_log_softmax=False,
               valid_cols=None, out_dtype=jnp.float32):
    """epilogue(A @ H, b).  A: (Np, Np) bf16, H: (Np, Fp) bf16, Fp % 128 == 0."""
    n = a.shape[0]
    f = h.shape[1]
    if valid_cols is None:
        valid_cols = f
    tm = _pick_tile(n, (256, 128))          # output-row tile (parallel axis)
    tk = _pick_tile(n, (512, 256, 128))     # reduction tile (arbitrary axis)
    kernel = functools.partial(
        _agg_kernel, apply_bias_relu=apply_bias_relu,
        apply_log_softmax=apply_log_softmax, valid_cols=valid_cols)
    return pl.pallas_call(
        kernel,
        out_shape=jax.ShapeDtypeStruct((n, f), out_dtype),
        grid=(n // tm, n // tk),
        in_specs=[
            pl.BlockSpec((tm, tk), lambda i, k: (i, k)),   # A_hat tile (bf16)
            pl.BlockSpec((tk, f), lambda i, k: (k, 0)),    # H tile     (bf16)
            pl.BlockSpec((1, f), lambda i, k: (0, 0)),     # bias
        ],
        out_specs=pl.BlockSpec((tm, f), lambda i, k: (i, 0)),
        scratch_shapes=[pltpu.VMEM((tm, f), jnp.float32)],  # f32 accumulator
        compiler_params=pltpu.CompilerParams(
            dimension_semantics=("parallel", "arbitrary")),
    )(a, h, b)


def dense_matmul(x, w, b, *, apply_bias_relu, apply_log_softmax=False,
                 valid_cols=None, out_dtype=jnp.float32):
    """epilogue(X @ W, b).  X: (Np, Fin_p), W: (Fin_p, Fout_p), dims % 128 == 0."""
    n, f_in = x.shape
    f_out = w.shape[1]
    if valid_cols is None:
        valid_cols = f_out
    tm = _pick_tile(n, (512, 256, 128))
    kernel = functools.partial(
        _dense_kernel, apply_bias_relu=apply_bias_relu,
        apply_log_softmax=apply_log_softmax, valid_cols=valid_cols)
    return pl.pallas_call(
        kernel,
        out_shape=jax.ShapeDtypeStruct((n, f_out), out_dtype),
        grid=(n // tm,),
        in_specs=[
            pl.BlockSpec((tm, f_in), lambda i: (i, 0)),
            pl.BlockSpec((f_in, f_out), lambda i: (0, 0)),
            pl.BlockSpec((1, f_out), lambda i: (0, 0)),
        ],
        out_specs=pl.BlockSpec((tm, f_out), lambda i: (i, 0)),
        compiler_params=pltpu.CompilerParams(
            dimension_semantics=("parallel",)),
    )(x, w, b)


# ----------------------------- glue (plain JAX) ----------------------------

def build_normalized_adjacency(edge_index, num_nodes):
    """Dense D^-1/2 (A + I) D^-1/2, matching PyG gcn_norm with self-loops."""
    src = edge_index[0]
    tgt = edge_index[1]
    adj = jnp.zeros((num_nodes, num_nodes), jnp.float32)
    adj = adj.at[tgt, src].add(1.0)                      # edge j -> i
    adj = adj + jnp.eye(num_nodes, dtype=jnp.float32)    # self-loops
    deg = jnp.sum(adj, axis=1)
    dinv = jnp.where(deg > 0, 1.0 / jnp.sqrt(deg), 0.0)
    return dinv[:, None] * adj * dinv[None, :]


def glorot(key, shape):
    fan_in, fan_out = shape
    limit = jnp.sqrt(6.0 / (fan_in + fan_out))
    return jax.random.uniform(key, shape, jnp.float32, -limit, limit)


def init_gcnnet_params(key, input_dim, hidden_dim, label_dim, num_layers):
    dims = [input_dim] + [hidden_dim] * (num_layers - 1) + [label_dim]
    params = []
    for l in range(num_layers):
        key, wk = jax.random.split(key)
        w = glorot(wk, (dims[l], dims[l + 1]))
        b = jnp.zeros((dims[l + 1],), jnp.float32)
        params.append((w, b))
    return params


@jax.jit
def gcnnet_forward(x, edge_index, params):
    """[GCNConv -> relu -> dropout(p=0)] * L, then log_softmax(dim=1)."""
    n, f0 = x.shape
    label_dim = params[-1][0].shape[1]
    num_layers = len(params)

    a = build_normalized_adjacency(edge_index, n)
    n_p = _round_up(n, 128)
    a_p = _pad2d(a, n_p, n_p).astype(jnp.bfloat16)       # bf16 A_hat (f32 acc)

    h = _pad2d(x.astype(jnp.float32), n_p, _round_up(f0, 128))

    for idx, (w, b) in enumerate(params):
        f_in, f_out = w.shape
        fin_p = _round_up(f_in, 128)
        fout_p = _round_up(f_out, 128)
        w_p = _pad2d(w.astype(jnp.float32), fin_p, fout_p)
        b_p = _pad2d(b.astype(jnp.float32).reshape(1, -1), 1, fout_p)
        is_last = idx == num_layers - 1

        if f_out <= f_in:
            # Transform first (cheaper contraction); bias+relu and, on the
            # last layer, log_softmax are fused into the aggregation finalize.
            hw = dense_matmul(h, w_p, b_p, apply_bias_relu=False,
                              out_dtype=jnp.bfloat16)
            h = agg_matmul(a_p, hw, b_p, apply_bias_relu=True,
                           apply_log_softmax=is_last, valid_cols=f_out)
        else:
            # Aggregate first (f_in < f_out): Z = A_hat @ X, then transform.
            z = agg_matmul(a_p, h.astype(jnp.bfloat16),
                           jnp.zeros((1, fin_p), jnp.float32),
                           apply_bias_relu=False)
            h = dense_matmul(z, w_p, b_p, apply_bias_relu=True,
                             apply_log_softmax=is_last, valid_cols=f_out)
        # dropout: p = 0.0 in the reference module -> identity

    return h[:n, :label_dim]


def gcnnet_forward_ref(x, edge_index, params):
    """Pure-JAX f32 reference for correctness checking."""
    n = x.shape[0]
    a = build_normalized_adjacency(edge_index, n)
    h = x.astype(jnp.float32)
    for w, b in params:
        h = jnp.maximum(a @ (h @ w) + b, 0.0)
    return jax.nn.log_softmax(h, axis=1)


# ----------------------------- main ----------------------------------------

if __name__ == "__main__":
    key = jax.random.PRNGKey(0)

    num_nodes = 16
    input_dim = 8
    hidden_dim = 32
    label_dim = 4
    num_layers = 3
    num_edges = 40

    k_feat, k_src, k_tgt, k_par = jax.random.split(key, 4)
    feat = jax.random.normal(k_feat, (num_nodes, input_dim), jnp.float32)
    src = jax.random.randint(k_src, (num_edges,), 0, num_nodes)
    tgt = jax.random.randint(k_tgt, (num_edges,), 0, num_nodes)
    edge_index = jnp.stack([src, tgt], axis=0)           # [2, E]

    params = init_gcnnet_params(
        k_par, input_dim, hidden_dim, label_dim, num_layers)

    out = gcnnet_forward(feat, edge_index, params)
    out = jax.block_until_ready(out)

    assert out.shape == (num_nodes, label_dim)
    # log_softmax rows must sum to 1 in probability space.
    assert jnp.allclose(jnp.sum(jnp.exp(out), axis=1), 1.0, atol=1e-4)

    # Loose tolerance vs f32 reference (aggregation runs in bf16 w/ f32 acc).
    ref = gcnnet_forward_ref(feat, edge_index, params)
    max_err = float(jnp.max(jnp.abs(out - ref)))
    assert max_err < 0.25, f"max abs err vs f32 reference: {max_err}"

    print("KERNEL_OK")
</pallas_src>

<mosaic_0001>
module attributes {stable_mosaic.version = 11 : i64} {
  func.func @_agg_kernel(%arg0: i32, %arg1: i32, %arg2: memref<128x128xbf16, #tpu.memory_space<vmem>>, %arg3: memref<128x128xbf16, #tpu.memory_space<vmem>>, %arg4: memref<1x128xf32, #tpu.memory_space<vmem>>, %arg5: memref<128x128xf32, #tpu.memory_space<vmem>>, %arg6: memref<128x128xf32, #tpu.memory_space<vmem>>) attributes {dimension_semantics = [#tpu.dimension_semantics<parallel>, #tpu.dimension_semantics<arbitrary>], iteration_bounds = array<i64: 1, 1>, scalar_prefetch = 0 : i64, scratch_operands = 1 : i64, tpu.core_type = #tpu.core_type<tc>, window_params = [{transform_indices = @transform_0, window_bounds = array<i64: 128, 128>}, {transform_indices = @transform_1, window_bounds = array<i64: 128, 128>}, {pipeline_mode = #tpu.pipeline_mode<synchronous>, transform_indices = @transform_2, window_bounds = array<i64: 1, 128>}, {transform_indices = @transform_3, window_bounds = array<i64: 128, 128>}]} {
    %c0_i32 = arith.constant 0 : i32
    %0 = arith.cmpi eq, %arg1, %c0_i32 : i32
    %1 = arith.extui %0 : i1 to i32
    %c0_i32_0 = arith.constant 0 : i32
    %2 = arith.cmpi ne, %1, %c0_i32_0 : i32
    scf.if %2 {
      %cst_10 = arith.constant 0.000000e+00 : f32
      %12 = vector.broadcast %cst_10 : f32 to vector<128x128xf32>
      %c0_11 = arith.constant 0 : index
      %c0_12 = arith.constant 0 : index
      %13 = vector.load %arg6[%c0_11, %c0_12] : memref<128x128xf32, #tpu.memory_space<vmem>>, vector<128x128xf32>
      tpu.vector_store %arg6[%c0_11, %c0_12], %12 {strides = array<i32>} : memref<128x128xf32, #tpu.memory_space<vmem>>, vector<128x128xf32>,
    } else {
    }
    %c0 = arith.constant 0 : index
    %c0_1 = arith.constant 0 : index
    %3 = vector.load %arg6[%c0, %c0_1] : memref<128x128xf32, #tpu.memory_space<vmem>>, vector<128x128xf32>
    %c0_2 = arith.constant 0 : index
    %c0_3 = arith.constant 0 : index
    %4 = vector.load %arg2[%c0_2, %c0_3] : memref<128x128xbf16, #tpu.memory_space<vmem>>, vector<128x128xbf16>
    %c0_4 = arith.constant 0 : index
    %c0_5 = arith.constant 0 : index
    %5 = vector.load %arg3[%c0_4, %c0_5] : memref<128x128xbf16, #tpu.memory_space<vmem>>, vector<128x128xbf16>
    %cst = arith.constant dense<0.000000e+00> : vector<128x128xf32>
    %6 = tpu.matmul %4, %5, %cst {dimension_numbers = #tpu.dot_dimension_numbers<[1], [0], [0], [1], [0, 0, 1, 1], [], []>} : vector<128x128xbf16>, vector<128x128xbf16>, vector<128x128xf32> -> vector<128x128xf32>
    %7 = arith.addf %3, %6 : vector<128x128xf32>
    %c0_6 = arith.constant 0 : index
    %c0_7 = arith.constant 0 : index
    %8 = vector.load %arg6[%c0_6, %c0_7] : memref<128x128xf32, #tpu.memory_space<vmem>>, vector<128x128xf32>
    tpu.vector_store %arg6[%c0_6, %c0_7], %7 {strides = array<i32>} : memref<128x128xf32, #tpu.memory_space<vmem>>, vector<128x128xf32>,
    %c0_i32_8 = arith.constant 0 : i32
    %9 = arith.cmpi eq, %arg1, %c0_i32_8 : i32
    %10 = arith.extui %9 : i1 to i32
    %c0_i32_9 = arith.constant 0 : i32
    %11 = arith.cmpi ne, %10, %c0_i32_9 : i32
    scf.if %11 {
      %c0_10 = arith.constant 0 : index
      %c0_11 = arith.constant 0 : index
      %12 = vector.load %arg6[%c0_10, %c0_11] : memref<128x128xf32, #tpu.memory_space<vmem>>, vector<128x128xf32>
      %c0_12 = arith.constant 0 : index
      %c0_13 = arith.constant 0 : index
      %13 = vector.load %arg5[%c0_12, %c0_13] : memref<128x128xf32, #tpu.memory_space<vmem>>, vector<128x128xf32>
      tpu.vector_store %arg5[%c0_12, %c0_13], %12 {strides = array<i32>} : memref<128x128xf32, #tpu.memory_space<vmem>>, vector<128x128xf32>,
    } else {
    }
    return
  }
  func.func @transform_0(%arg0: i32, %arg1: i32) -> (i32, i32) {
    %c0_i32 = arith.constant 0 : i32
    return %arg0, %arg1 : i32, i32
  }
  func.func @transform_1(%arg0: i32, %arg1: i32) -> (i32, i32) {
    %c0_i32 = arith.constant 0 : i32
    %c0_i32_0 = arith.constant 0 : i32
    return %arg1, %c0_i32 : i32, i32
  }
  func.func @transform_2(%arg0: i32, %arg1: i32) -> (i32, i32) {
    %c0_i32 = arith.constant 0 : i32
    %c0_i32_0 = arith.constant 0 : i32
    %c0_i32_1 = arith.constant 0 : i32
    return %c0_i32, %c0_i32_0 : i32, i32
  }
  func.func @transform_3(%arg0: i32, %arg1: i32) -> (i32, i32) {
    %c0_i32 = arith.constant 0 : i32
    %c0_i32_0 = arith.constant 0 : i32
    return %arg0, %c0_i32 : i32, i32
  }
}

module attributes {stable_mosaic.version = 11 : i64} {
  func.func @_dense_kernel(%arg0: i32, %arg1: memref<128x128xf32, #tpu.memory_space<vmem>>, %arg2: memref<128x128xf32, #tpu.memory_space<vmem>>, %arg3: memref<1x128xf32, #tpu.memory_space<vmem>>, %arg4: memref<128x128xf32, #tpu.memory_space<vmem>>) attributes {dimension_semantics = [#tpu.dimension_semantics<parallel>], iteration_bounds = array<i64: 1>, scalar_prefetch = 0 : i64, scratch_operands = 0 : i64, tpu.core_type = #tpu.core_type<tc>, window_params = [{transform_indices = @transform_0, window_bounds = array<i64: 128, 128>}, {pipeline_mode = #tpu.pipeline_mode<synchronous>, transform_indices = @transform_1, window_bounds = array<i64: 128, 128>}, {pipeline_mode = #tpu.pipeline_mode<synchronous>, transform_indices = @transform_2, window_bounds = array<i64: 1, 128>}, {transform_indices = @transform_3, window_bounds = array<i64: 128, 128>}]} {
    %c0 = arith.constant 0 : index
    %c0_0 = arith.constant 0 : index
    %0 = vector.load %arg1[%c0, %c0_0] : memref<128x128xf32, #tpu.memory_space<vmem>>, vector<128x128xf32>
    %c0_1 = arith.constant 0 : index
    %c0_2 = arith.constant 0 : index
    %1 = vector.load %arg2[%c0_1, %c0_2] : memref<128x128xf32, #tpu.memory_space<vmem>>, vector<128x128xf32>
    %cst = arith.constant dense<0.000000e+00> : vector<128x128xf32>
    %2 = tpu.matmul %0, %1, %cst {dimension_numbers = #tpu.dot_dimension_numbers<[1], [0], [0], [1], [0, 0, 1, 1], [], []>} : vector<128x128xf32>, vector<128x128xf32>, vector<128x128xf32> -> vector<128x128xf32>
    %c0_3 = arith.constant 0 : index
    %c0_4 = arith.constant 0 : index
    %3 = vector.load %arg3[%c0_3, %c0_4] : memref<1x128xf32, #tpu.memory_space<vmem>>, vector<1x128xf32>
    %4 = vector.broadcast %3 : vector<1x128xf32> to vector<128x128xf32>
    %5 = arith.addf %2, %4 : vector<128x128xf32>
    %cst_5 = arith.constant 0.000000e+00 : f32
    %6 = vector.broadcast %cst_5 : f32 to vector<128x128xf32>
    %7 = arith.maximumf %5, %6 : vector<128x128xf32>
    %c0_6 = arith.constant 0 : index
    %c0_7 = arith.constant 0 : index
    %8 = vector.load %arg4[%c0_6, %c0_7] : memref<128x128xf32, #tpu.memory_space<vmem>>, vector<128x128xf32>
    tpu.vector_store %arg4[%c0_6, %c0_7], %7 {strides = array<i32>} : memref<128x128xf32, #tpu.memory_space<vmem>>, vector<128x128xf32>,
    return
  }
  func.func @transform_0(%arg0: i32) -> (i32, i32) {
    %c0_i32 = arith.constant 0 : i32
    %c0_i32_0 = arith.constant 0 : i32
    return %arg0, %c0_i32 : i32, i32
  }
  func.func @transform_1(%arg0: i32) -> (i32, i32) {
    %c0_i32 = arith.constant 0 : i32
    %c0_i32_0 = arith.constant 0 : i32
    %c0_i32_1 = arith.constant 0 : i32
    return %c0_i32, %c0_i32_0 : i32, i32
  }
  func.func @transform_2(%arg0: i32) -> (i32, i32) {
    %c0_i32 = arith.constant 0 : i32
    %c0_i32_0 = arith.constant 0 : i32
    %c0_i32_1 = arith.constant 0 : i32
    return %c0_i32, %c0_i32_0 : i32, i32
  }
  func.func @transform_3(%arg0: i32) -> (i32, i32) {
    %c0_i32 = arith.constant 0 : i32
    %c0_i32_0 = arith.constant 0 : i32
    return %arg0, %c0_i32 : i32, i32
  }
}

module attributes {stable_mosaic.version = 11 : i64} {
  func.func @_dense_kernel(%arg0: i32, %arg1: memref<128x128xf32, #tpu.memory_space<vmem>>, %arg2: memref<128x128xf32, #tpu.memory_space<vmem>>, %arg3: memref<1x128xf32, #tpu.memory_space<vmem>>, %arg4: memref<128x128xbf16, #tpu.memory_space<vmem>>) attributes {dimension_semantics = [#tpu.dimension_semantics<parallel>], iteration_bounds = array<i64: 1>, scalar_prefetch = 0 : i64, scratch_operands = 0 : i64, tpu.core_type = #tpu.core_type<tc>, window_params = [{transform_indices = @transform_0, window_bounds = array<i64: 128, 128>}, {pipeline_mode = #tpu.pipeline_mode<synchronous>, transform_indices = @transform_1, window_bounds = array<i64: 128, 128>}, {pipeline_mode = #tpu.pipeline_mode<synchronous>, transform_indices = @transform_2, window_bounds = array<i64: 1, 128>}, {transform_indices = @transform_3, window_bounds = array<i64: 128, 128>}]} {
    %c0 = arith.constant 0 : index
    %c0_0 = arith.constant 0 : index
    %0 = vector.load %arg1[%c0, %c0_0] : memref<128x128xf32, #tpu.memory_space<vmem>>, vector<128x128xf32>
    %c0_1 = arith.constant 0 : index
    %c0_2 = arith.constant 0 : index
    %1 = vector.load %arg2[%c0_1, %c0_2] : memref<128x128xf32, #tpu.memory_space<vmem>>, vector<128x128xf32>
    %cst = arith.constant dense<0.000000e+00> : vector<128x128xf32>
    %2 = tpu.matmul %0, %1, %cst {dimension_numbers = #tpu.dot_dimension_numbers<[1], [0], [0], [1], [0, 0, 1, 1], [], []>} : vector<128x128xf32>, vector<128x128xf32>, vector<128x128xf32> -> vector<128x128xf32>
    %3 = arith.truncf %2 : vector<128x128xf32> to vector<128x128xbf16>
    %c0_3 = arith.constant 0 : index
    %c0_4 = arith.constant 0 : index
    %4 = vector.load %arg4[%c0_3, %c0_4] : memref<128x128xbf16, #tpu.memory_space<vmem>>, vector<128x128xbf16>
    tpu.vector_store %arg4[%c0_3, %c0_4], %3 {strides = array<i32>} : memref<128x128xbf16, #tpu.memory_space<vmem>>, vector<128x128xbf16>,
    return
  }
  func.func @transform_0(%arg0: i32) -> (i32, i32) {
    %c0_i32 = arith.constant 0 : i32
    %c0_i32_0 = arith.constant 0 : i32
    return %arg0, %c0_i32 : i32, i32
  }
  func.func @transform_1(%arg0: i32) -> (i32, i32) {
    %c0_i32 = arith.constant 0 : i32
    %c0_i32_0 = arith.constant 0 : i32
    %c0_i32_1 = arith.constant 0 : i32
    return %c0_i32, %c0_i32_0 : i32, i32
  }
  func.func @transform_2(%arg0: i32) -> (i32, i32) {
    %c0_i32 = arith.constant 0 : i32
    %c0_i32_0 = arith.constant 0 : i32
    %c0_i32_1 = arith.constant 0 : i32
    return %c0_i32, %c0_i32_0 : i32, i32
  }
  func.func @transform_3(%arg0: i32) -> (i32, i32) {
    %c0_i32 = arith.constant 0 : i32
    %c0_i32_0 = arith.constant 0 : i32
    return %arg0, %c0_i32 : i32, i32
  }
}

module attributes {stable_mosaic.version = 11 : i64} {
  func.func @_agg_kernel(%arg0: i32, %arg1: i32, %arg2: memref<128x128xbf16, #tpu.memory_space<vmem>>, %arg3: memref<128x128xbf16, #tpu.memory_space<vmem>>, %arg4: memref<1x128xf32, #tpu.memory_space<vmem>>, %arg5: memref<128x128xf32, #tpu.memory_space<vmem>>, %arg6: memref<128x128xf32, #tpu.memory_space<vmem>>) attributes {dimension_semantics = [#tpu.dimension_semantics<parallel>, #tpu.dimension_semantics<arbitrary>], iteration_bounds = array<i64: 1, 1>, scalar_prefetch = 0 : i64, scratch_operands = 1 : i64, tpu.core_type = #tpu.core_type<tc>, window_params = [{transform_indices = @transform_0, window_bounds = array<i64: 128, 128>}, {transform_indices = @transform_1, window_bounds = array<i64: 128, 128>}, {pipeline_mode = #tpu.pipeline_mode<synchronous>, transform_indices = @transform_2, window_bounds = array<i64: 1, 128>}, {transform_indices = @transform_3, window_bounds = array<i64: 128, 128>}]} {
    %c0_i32 = arith.constant 0 : i32
    %0 = arith.cmpi eq, %arg1, %c0_i32 : i32
    %1 = arith.extui %0 : i1 to i32
    %c0_i32_0 = arith.constant 0 : i32
    %2 = arith.cmpi ne, %1, %c0_i32_0 : i32
    scf.if %2 {
      %cst_10 = arith.constant 0.000000e+00 : f32
      %12 = vector.broadcast %cst_10 : f32 to vector<128x128xf32>
      %c0_11 = arith.constant 0 : index
      %c0_12 = arith.constant 0 : index
      %13 = vector.load %arg6[%c0_11, %c0_12] : memref<128x128xf32, #tpu.memory_space<vmem>>, vector<128x128xf32>
      tpu.vector_store %arg6[%c0_11, %c0_12], %12 {strides = array<i32>} : memref<128x128xf32, #tpu.memory_space<vmem>>, vector<128x128xf32>,
    } else {
    }
    %c0 = arith.constant 0 : index
    %c0_1 = arith.constant 0 : index
    %3 = vector.load %arg6[%c0, %c0_1] : memref<128x128xf32, #tpu.memory_space<vmem>>, vector<128x128xf32>
    %c0_2 = arith.constant 0 : index
    %c0_3 = arith.constant 0 : index
    %4 = vector.load %arg2[%c0_2, %c0_3] : memref<128x128xbf16, #tpu.memory_space<vmem>>, vector<128x128xbf16>
    %c0_4 = arith.constant 0 : index
    %c0_5 = arith.constant 0 : index
    %5 = vector.load %arg3[%c0_4, %c0_5] : memref<128x128xbf16, #tpu.memory_space<vmem>>, vector<128x128xbf16>
    %cst = arith.constant dense<0.000000e+00> : vector<128x128xf32>
    %6 = tpu.matmul %4, %5, %cst {dimension_numbers = #tpu.dot_dimension_numbers<[1], [0], [0], [1], [0, 0, 1, 1], [], []>} : vector<128x128xbf16>, vector<128x128xbf16>, vector<128x128xf32> -> vector<128x128xf32>
    %7 = arith.addf %3, %6 : vector<128x128xf32>
    %c0_6 = arith.constant 0 : index
    %c0_7 = arith.constant 0 : index
    %8 = vector.load %arg6[%c0_6, %c0_7] : memref<128x128xf32, #tpu.memory_space<vmem>>, vector<128x128xf32>
    tpu.vector_store %arg6[%c0_6, %c0_7], %7 {strides = array<i32>} : memref<128x128xf32, #tpu.memory_space<vmem>>, vector<128x128xf32>,
    %c0_i32_8 = arith.constant 0 : i32
    %9 = arith.cmpi eq, %arg1, %c0_i32_8 : i32
    %10 = arith.extui %9 : i1 to i32
    %c0_i32_9 = arith.constant 0 : i32
    %11 = arith.cmpi ne, %10, %c0_i32_9 : i32
    scf.if %11 {
      %c0_10 = arith.constant 0 : index
      %c0_11 = arith.constant 0 : index
      %12 = vector.load %arg6[%c0_10, %c0_11] : memref<128x128xf32, #tpu.memory_space<vmem>>, vector<128x128xf32>
      %c0_12 = arith.constant 0 : index
      %c0_13 = arith.constant 0 : index
      %13 = vector.load %arg4[%c0_12, %c0_13] : memref<1x128xf32, #tpu.memory_space<vmem>>, vector<1x128xf32>
      %14 = vector.broadcast %13 : vector<1x128xf32> to vector<128x128xf32>
      %15 = arith.addf %12, %14 : vector<128x128xf32>
      %cst_14 = arith.constant 0.000000e+00 : f32
      %16 = vector.broadcast %cst_14 : f32 to vector<128x128xf32>
      %17 = arith.maximumf %15, %16 : vector<128x128xf32>
      %c0_15 = arith.constant 0 : index
      %c0_16 = arith.constant 0 : index
      %18 = vector.load %arg5[%c0_15, %c0_16] : memref<128x128xf32, #tpu.memory_space<vmem>>, vector<128x128xf32>
      tpu.vector_store %arg5[%c0_15, %c0_16], %17 {strides = array<i32>} : memref<128x128xf32, #tpu.memory_space<vmem>>, vector<128x128xf32>,
    } else {
    }
    return
  }
  func.func @transform_0(%arg0: i32, %arg1: i32) -> (i32, i32) {
    %c0_i32 = arith.constant 0 : i32
    return %arg0, %arg1 : i32, i32
  }
  func.func @transform_1(%arg0: i32, %arg1: i32) -> (i32, i32) {
    %c0_i32 = arith.constant 0 : i32
    %c0_i32_0 = arith.constant 0 : i32
    return %arg1, %c0_i32 : i32, i32
  }
  func.func @transform_2(%arg0: i32, %arg1: i32) -> (i32, i32) {
    %c0_i32 = arith.constant 0 : i32
    %c0_i32_0 = arith.constant 0 : i32
    %c0_i32_1 = arith.constant 0 : i32
    return %c0_i32, %c0_i32_0 : i32, i32
  }
  func.func @transform_3(%arg0: i32, %arg1: i32) -> (i32, i32) {
    %c0_i32 = arith.constant 0 : i32
    %c0_i32_0 = arith.constant 0 : i32
    return %arg0, %c0_i32 : i32, i32
  }
}

module attributes {stable_mosaic.version = 11 : i64} {
  func.func @_agg_kernel(%arg0: i32, %arg1: i32, %arg2: memref<128x128xbf16, #tpu.memory_space<vmem>>, %arg3: memref<128x128xbf16, #tpu.memory_space<vmem>>, %arg4: memref<1x128xf32, #tpu.memory_space<vmem>>, %arg5: memref<128x128xf32, #tpu.memory_space<vmem>>, %arg6: memref<128x128xf32, #tpu.memory_space<vmem>>) attributes {dimension_semantics = [#tpu.dimension_semantics<parallel>, #tpu.dimension_semantics<arbitrary>], iteration_bounds = array<i64: 1, 1>, scalar_prefetch = 0 : i64, scratch_operands = 1 : i64, tpu.core_type = #tpu.core_type<tc>, window_params = [{transform_indices = @transform_0, window_bounds = array<i64: 128, 128>}, {transform_indices = @transform_1, window_bounds = array<i64: 128, 128>}, {pipeline_mode = #tpu.pipeline_mode<synchronous>, transform_indices = @transform_2, window_bounds = array<i64: 1, 128>}, {transform_indices = @transform_3, window_bounds = array<i64: 128, 128>}]} {
    %c0_i32 = arith.constant 0 : i32
    %0 = arith.cmpi eq, %arg1, %c0_i32 : i32
    %1 = arith.extui %0 : i1 to i32
    %c0_i32_0 = arith.constant 0 : i32
    %2 = arith.cmpi ne, %1, %c0_i32_0 : i32
    scf.if %2 {
      %cst_10 = arith.constant 0.000000e+00 : f32
      %12 = vector.broadcast %cst_10 : f32 to vector<128x128xf32>
      %c0_11 = arith.constant 0 : index
      %c0_12 = arith.constant 0 : index
      %13 = vector.load %arg6[%c0_11, %c0_12] : memref<128x128xf32, #tpu.memory_space<vmem>>, vector<128x128xf32>
      tpu.vector_store %arg6[%c0_11, %c0_12], %12 {strides = array<i32>} : memref<128x128xf32, #tpu.memory_space<vmem>>, vector<128x128xf32>,
    } else {
    }
    %c0 = arith.constant 0 : index
    %c0_1 = arith.constant 0 : index
    %3 = vector.load %arg6[%c0, %c0_1] : memref<128x128xf32, #tpu.memory_space<vmem>>, vector<128x128xf32>
    %c0_2 = arith.constant 0 : index
    %c0_3 = arith.constant 0 : index
    %4 = vector.load %arg2[%c0_2, %c0_3] : memref<128x128xbf16, #tpu.memory_space<vmem>>, vector<128x128xbf16>
    %c0_4 = arith.constant 0 : index
    %c0_5 = arith.constant 0 : index
    %5 = vector.load %arg3[%c0_4, %c0_5] : memref<128x128xbf16, #tpu.memory_space<vmem>>, vector<128x128xbf16>
    %cst = arith.constant dense<0.000000e+00> : vector<128x128xf32>
    %6 = tpu.matmul %4, %5, %cst {dimension_numbers = #tpu.dot_dimension_numbers<[1], [0], [0], [1], [0, 0, 1, 1], [], []>} : vector<128x128xbf16>, vector<128x128xbf16>, vector<128x128xf32> -> vector<128x128xf32>
    %7 = arith.addf %3, %6 : vector<128x128xf32>
    %c0_6 = arith.constant 0 : index
    %c0_7 = arith.constant 0 : index
    %8 = vector.load %arg6[%c0_6, %c0_7] : memref<128x128xf32, #tpu.memory_space<vmem>>, vector<128x128xf32>
    tpu.vector_store %arg6[%c0_6, %c0_7], %7 {strides = array<i32>} : memref<128x128xf32, #tpu.memory_space<vmem>>, vector<128x128xf32>,
    %c0_i32_8 = arith.constant 0 : i32
    %9 = arith.cmpi eq, %arg1, %c0_i32_8 : i32
    %10 = arith.extui %9 : i1 to i32
    %c0_i32_9 = arith.constant 0 : i32
    %11 = arith.cmpi ne, %10, %c0_i32_9 : i32
    scf.if %11 {
      %c0_10 = arith.constant 0 : index
      %c0_11 = arith.constant 0 : index
      %12 = vector.load %arg6[%c0_10, %c0_11] : memref<128x128xf32, #tpu.memory_space<vmem>>, vector<128x128xf32>
      %c0_12 = arith.constant 0 : index
      %c0_13 = arith.constant 0 : index
      %13 = vector.load %arg4[%c0_12, %c0_13] : memref<1x128xf32, #tpu.memory_space<vmem>>, vector<1x128xf32>
      %14 = vector.broadcast %13 : vector<1x128xf32> to vector<128x128xf32>
      %15 = arith.addf %12, %14 : vector<128x128xf32>
      %cst_14 = arith.constant 0.000000e+00 : f32
      %16 = vector.broadcast %cst_14 : f32 to vector<128x128xf32>
      %17 = arith.maximumf %15, %16 : vector<128x128xf32>
      %18 = tpu.iota {dimensions = array<i32: 1>} : vector<128x128xi32>
      %c4_i32 = arith.constant 4 : i32
      %19 = vector.broadcast %c4_i32 : i32 to vector<128x128xi32>
      %20 = arith.cmpi slt, %18, %19 : vector<128x128xi32>
      %cst_15 = arith.constant -1.000000e+30 : f32
      %21 = vector.broadcast %cst_15 : f32 to vector<128x128xf32>
      %22 = arith.select %20, %17, %21 : vector<128x128xi1>, vector<128x128xf32>
      %cst_16 = arith.constant dense<0xFF800000> : vector<128xf32>
      %23 = vector.multi_reduction <maximumf>, %22, %cst_16 [1] : vector<128x128xf32> to vector<128xf32>
      %24 = vector.shape_cast %23 : vector<128xf32> to vector<128x1xf32>
      %25 = vector.broadcast %24 : vector<128x1xf32> to vector<128x128xf32>
      %26 = arith.subf %22, %25 : vector<128x128xf32>
      %27 = math.exp %26 : vector<128x128xf32>
      %cst_17 = arith.constant dense<0.000000e+00> : vector<128xf32>
      %28 = vector.multi_reduction <add>, %27, %cst_17 [1] : vector<128x128xf32> to vector<128xf32>
      %29 = vector.shape_cast %28 : vector<128xf32> to vector<128x1xf32>
      %30 = math.log %29 : vector<128x1xf32>
      %31 = vector.broadcast %30 : vector<128x1xf32> to vector<128x128xf32>
      %32 = arith.subf %26, %31 : vector<128x128xf32>
      %c0_18 = arith.constant 0 : index
      %c0_19 = arith.constant 0 : index
      %33 = vector.load %arg5[%c0_18, %c0_19] : memref<128x128xf32, #tpu.memory_space<vmem>>, vector<128x128xf32>
      tpu.vector_store %arg5[%c0_18, %c0_19], %32 {strides = array<i32>} : memref<128x128xf32, #tpu.memory_space<vmem>>, vector<128x128xf32>,
    } else {
    }
    return
  }
  func.func @transform_0(%arg0: i32, %arg1: i32) -> (i32, i32) {
    %c0_i32 = arith.constant 0 : i32
    return %arg0, %arg1 : i32, i32
  }
  func.func @transform_1(%arg0: i32, %arg1: i32) -> (i32, i32) {
    %c0_i32 = arith.constant 0 : i32
    %c0_i32_0 = arith.constant 0 : i32
    return %arg1, %c0_i32 : i32, i32
  }
  func.func @transform_2(%arg0: i32, %arg1: i32) -> (i32, i32) {
    %c0_i32 = arith.constant 0 : i32
    %c0_i32_0 = arith.constant 0 : i32
    %c0_i32_1 = arith.constant 0 : i32
    return %c0_i32, %c0_i32_0 : i32, i32
  }
  func.func @transform_3(%arg0: i32, %arg1: i32) -> (i32, i32) {
    %c0_i32 = arith.constant 0 : i32
    %c0_i32_0 = arith.constant 0 : i32
    return %arg0, %c0_i32 : i32, i32
  }
}

</mosaic_0001>

<bundles_post_ra>
// kernel: gcnnet_forward.6
= control target key start
LH: loop header
LB: loop body
LE: loop exit
PB: predicated region body
PF: predicated region fallthrough
CT: control target
= control target key end

     0   :  { %s559_s1 = inlined_call_operand.vmem [shape: bf16[128,128], index: 1, kind: input, shape index: {}]   ;;  %s560_s2 = inlined_call_operand.vmem [shape: f32[1,128], index: 2, kind: input, shape index: {}]   ;;  %s561_s0 = inlined_call_operand.vmem [shape: bf16[128,128], index: 0, kind: input, shape index: {}]   ;;  %s562_s3 = inlined_call_operand.vmem [shape: f32[128,128], index: 3, kind: output, shape index: {}]  }
   0x1   :  { %v427_v0 = vld [vmem:[%s559_s1] sm:$0xff]   ;;  %v428_v1 = vld [vmem:[%s559_s1 + $0x8] sm:$0xff]   ;;  %v429_v2 = vld [vmem:[%s559_s1 + $0x10] sm:$0xff]  }
   0x2   :  { %379 = vmatprep.subr.bf16.mxu0 %v427_v0  ;;  %411 = vmatprep.subr.bf16.mxu1 %v427_v0  ;;  %v430_v3 = vld [vmem:[%s559_s1 + $0x18] sm:$0xff]   ;;  %v435_v4 = vld [vmem:[%s561_s0] sm:$0xff]   ;;  %v432_v7 = vld [vmem:[%s559_s1 + $0x28] sm:$0xff]  }
   0x3   :  { %380 = vmatpush3.bf16.msra.mxu0 %v427_v0  ;;  %419 = vmatpush3.bf16.msra.mxu1 %v427_v0  ;;  %v436_v5 = vld [vmem:[%s561_s0 + $0x20] sm:$0xff]   ;;  %v433_v8 = vld [vmem:[%s559_s1 + $0x30] sm:$0xff]   ;;  %v434_v9 = vld [vmem:[%s559_s1 + $0x38] sm:$0xff]  }
   0x4   :  { %381 = vmatprep.subr.bf16.mxu0 %v428_v1  ;;  %412 = vmatprep.subr.bf16.mxu1 %v428_v1  ;;  %v431_v6 = vld [vmem:[%s559_s1 + $0x20] sm:$0xff]   ;;  %v437_v10 = vld [vmem:[%s561_s0 + $0x8] sm:$0xff]   ;;  %v439_v12 = vld [vmem:[%s561_s0 + $0x10] sm:$0xff]  }
   0x5   :  { %395 = vmatprep.mubr.bf16.mxu0 %v435_v4  ;;  %403 = vmatprep.mubr.bf16.mxu1 %v436_v5  ;;  %v438_v11 = vld [vmem:[%s561_s0 + $0x28] sm:$0xff]   ;;  %v440_v13 = vld [vmem:[%s561_s0 + $0x30] sm:$0xff]   ;;  %v441_v14 = vld [vmem:[%s561_s0 + $0x18] sm:$0xff]  }
   0x6   :  { %v442_v15 = vld [vmem:[%s561_s0 + $0x38] sm:$0xff]  }
   0x7   :  { %382 = vmatpush3.bf16.msra.mxu0 %v428_v1  ;;  %420 = vmatpush3.bf16.msra.mxu1 %v428_v1 }
   0x8   :  { %383 = vmatprep.subr.bf16.mxu0 %v429_v2  ;;  %413 = vmatprep.subr.bf16.mxu1 %v429_v2 }
   0xb   :  { %384 = vmatpush3.bf16.msra.mxu0 %v429_v2  ;;  %421 = vmatpush3.bf16.msra.mxu1 %v429_v2 }
   0xc   :  { %385 = vmatprep.subr.bf16.mxu0 %v430_v3  ;;  %414 = vmatprep.subr.bf16.mxu1 %v430_v3 }
   0xf   :  { %386 = vmatpush3.bf16.msra.mxu0 %v430_v3  ;;  %422 = vmatpush3.bf16.msra.mxu1 %v430_v3 }
  0x10   :  { %387 = vmatprep.subr.bf16.mxu0 %v431_v6  ;;  %415 = vmatprep.subr.bf16.mxu1 %v431_v6 }
  0x13   :  { %388 = vmatpush3.bf16.msra.mxu0 %v431_v6  ;;  %423 = vmatpush3.bf16.msra.mxu1 %v431_v6 }
  0x14   :  { %389 = vmatprep.subr.bf16.mxu0 %v432_v7  ;;  %416 = vmatprep.subr.bf16.mxu1 %v432_v7 }
  0x17   :  { %390 = vmatpush3.bf16.msra.mxu0 %v432_v7  ;;  %424 = vmatpush3.bf16.msra.mxu1 %v432_v7 }
  0x18   :  { %391 = vmatprep.subr.bf16.mxu0 %v433_v8  ;;  %417 = vmatprep.subr.bf16.mxu1 %v433_v8 }
  0x1b   :  { %392 = vmatpush3.bf16.msra.mxu0 %v433_v8  ;;  %425 = vmatpush3.bf16.msra.mxu1 %v433_v8 }
  0x1c   :  { %393 = vmatprep.subr.bf16.mxu0 %v434_v9  ;;  %418 = vmatprep.subr.bf16.mxu1 %v434_v9 }
  0x1f   :  { %394 = vmatpush3.bf16.msra.mxu0 %v434_v9  ;;  %426 = vmatpush3.bf16.msra.mxu1 %v434_v9 }
  0x22   :  { %396 = vmatmul.mubr.bf16.vlgmr.msra.gmra.mrb[0].mxu0 %v437_v10  ;;  %404 = vmatmul.mubr.bf16.vlgmr.msra.gmra.mrb[0].mxu1 %v438_v11 }
  0x23   :  { %399 = vmatprep.mubr.bf16.mxu0 %v439_v12  ;;  %407 = vmatprep.mubr.bf16.mxu1 %v440_v13 }
  0x2a   :  { %400 = vmatmul.mubr.bf16.gmra.mrb[4].mxu0 %v441_v14  ;;  %408 = vmatmul.mubr.bf16.gmra.mrb[4].mxu1 %v442_v15 }
  0xf5   :  { %v397_v16 = vpop.f32.mrb[0].mxu0  ;;  %v405_v17 = vpop.f32.mrb[0].mxu1 }
  0xf6   :  { %329 = vst [vmem:[%s562_s3 + $0x10] sm:$0xff] %v397_v16  ;;  %337 = vst [vmem:[%s562_s3 + $0x50] sm:$0xff] %v405_v17  ;;  %v213_v18 = vpop.f32.mrb[1].mxu0  ;;  %v245_v19 = vpop.f32.mrb[1].mxu1 }
  0xf7   :  { %327 = vst [vmem:[%s562_s3] sm:$0xff] %v213_v18  ;;  %335 = vst [vmem:[%s562_s3 + $0x40] sm:$0xff] %v245_v19  ;;  %v398_v20 = vpop.f32.mrb[2].mxu0  ;;  %v406_v21 = vpop.f32.mrb[2].mxu1 }
  0xf8   :  { %330 = vst [vmem:[%s562_s3 + $0x18] sm:$0xff] %v398_v20  ;;  %338 = vst [vmem:[%s562_s3 + $0x58] sm:$0xff] %v406_v21  ;;  %v216_v22 = vpop.f32.mrb[3].mxu0  ;;  %v248_v23 = vpop.f32.mrb[3].mxu1 }
  0xf9   :  { %328 = vst [vmem:[%s562_s3 + $0x8] sm:$0xff] %v216_v22  ;;  %336 = vst [vmem:[%s562_s3 + $0x48] sm:$0xff] %v248_v23 }
  0xfd   :  { %v401_v24 = vpop.f32.mrb[4].mxu0  ;;  %v409_v25 = vpop.f32.mrb[4].mxu1 }
  0xfe   :  { %333 = vst [vmem:[%s562_s3 + $0x30] sm:$0xff] %v401_v24  ;;  %341 = vst [vmem:[%s562_s3 + $0x70] sm:$0xff] %v409_v25  ;;  %v229_v26 = vpop.f32.mrb[5].mxu0  ;;  %v261_v27 = vpop.f32.mrb[5].mxu1 }
  0xff   :  { %331 = vst [vmem:[%s562_s3 + $0x20] sm:$0xff] %v229_v26  ;;  %339 = vst [vmem:[%s562_s3 + $0x60] sm:$0xff] %v261_v27  ;;  %v402_v28 = vpop.f32.mrb[6].mxu0  ;;  %v410_v29 = vpop.f32.mrb[6].mxu1 }
 0x100   :  { %334 = vst [vmem:[%s562_s3 + $0x38] sm:$0xff] %v402_v28  ;;  %342 = vst [vmem:[%s562_s3 + $0x78] sm:$0xff] %v410_v29  ;;  %v232_v30 = vpop.f32.mrb[7].mxu0  ;;  %v264_v31 = vpop.f32.mrb[7].mxu1 }
 0x101   :  { %332 = vst [vmem:[%s562_s3 + $0x28] sm:$0xff] %v232_v30  ;;  %340 = vst [vmem:[%s562_s3 + $0x68] sm:$0xff] %v264_v31 }

// kernel: gcnnet_forward.7
= control target key start
LH: loop header
LB: loop body
LE: loop exit
PB: predicated region body
PF: predicated region fallthrough
CT: control target
= control target key end

     0   :  { %s538_s1 = inlined_call_operand.vmem [shape: f32[128,128], index: 1, kind: input, shape index: {}]   ;;  %s539_s0 = inlined_call_operand.vmem [shape: f32[128,128], index: 0, kind: input, shape index: {}]   ;;  %s540_s2 = inlined_call_operand.vmem [shape: f32[1,128], index: 2, kind: input, shape index: {}]   ;;  %s541_s3 = inlined_call_operand.vmem [shape: f32[128,128], index: 3, kind: output, shape index: {}]  }
   0x1   :  { %v30_v0 = vld [vmem:[%s538_s1] sm:$0xff]  ;;  %v31_v1 = vld [vmem:[%s538_s1 + $0x8] sm:$0xff]  ;;  %v32_v2 = vld [vmem:[%s538_s1 + $0x10] sm:$0xff] }
   0x2   :  { %v323_v3 = vpack.c.bf16 %v31_v1, %v30_v0  ;;  %v33_v4 = vld [vmem:[%s538_s1 + $0x18] sm:$0xff]  ;;  %v34_v6 = vld [vmem:[%s538_s1 + $0x20] sm:$0xff]  ;;  %v35_v7 = vld [vmem:[%s538_s1 + $0x28] sm:$0xff] }
   0x3   :  { %v327_v5 = vpack.c.bf16 %v33_v4, %v32_v2  ;;  %v331_v8 = vpack.c.bf16 %v35_v7, %v34_v6  ;;  %v14_v9 = vld [vmem:[%s539_s0] sm:$0xff]  ;;  %v36_v11 = vld [vmem:[%s538_s1 + $0x30] sm:$0xff]  ;;  %v37_v12 = vld [vmem:[%s538_s1 + $0x38] sm:$0xff] }
   0x4   :  { %324 = vmatprep.subr.bf16.mxu0 %v323_v3  ;;  %355 = vmatprep.subr.bf16.mxu1 %v323_v3  ;;  %v22_v10 = vld [vmem:[%s539_s0 + $0x40] sm:$0xff]  ;;  %v335_v13 = vpack.c.bf16 %v37_v12, %v36_v11  ;;  %v39_v15 = vld [vmem:[%s538_s1 + $0x48] sm:$0xff]  ;;  %v40_v17 = vld [vmem:[%s538_s1 + $0x50] sm:$0xff] }
   0x5   :  { %326 = vmatpush3.bf16.msra.mxu0 %v323_v3  ;;  %363 = vmatpush3.bf16.msra.mxu1 %v323_v3  ;;  %v38_v14 = vld [vmem:[%s538_s1 + $0x40] sm:$0xff]  ;;  %v41_v18 = vld [vmem:[%s538_s1 + $0x58] sm:$0xff]  ;;  %v43_v21 = vld [vmem:[%s538_s1 + $0x68] sm:$0xff] }
   0x6   :  { %328 = vmatprep.subr.bf16.mxu0 %v327_v5  ;;  %356 = vmatprep.subr.bf16.mxu1 %v327_v5  ;;  %v339_v16 = vpack.c.bf16 %v39_v15, %v38_v14  ;;  %v343_v19 = vpack.c.bf16 %v41_v18, %v40_v17  ;;  %v42_v20 = vld [vmem:[%s538_s1 + $0x60] sm:$0xff]  ;;  %v44_v23 = vld [vmem:[%s538_s1 + $0x70] sm:$0xff]  ;;  %v45_v24 = vld [vmem:[%s538_s1 + $0x78] sm:$0xff] }
   0x7   :  { %299 = vmatprep.mubr.f32.mxu0 %v14_v9  ;;  %311 = vmatprep.mubr.f32.mxu1 %v22_v10  ;;  %v347_v22 = vpack.c.bf16 %v43_v21, %v42_v20  ;;  %v351_v25 = vpack.c.bf16 %v45_v24, %v44_v23  ;;  %v15_v26 = vld [vmem:[%s539_s0 + $0x8] sm:$0xff]  ;;  %v16_v28 = vld [vmem:[%s539_s0 + $0x10] sm:$0xff]  ;;  %v17_v30 = vld [vmem:[%s539_s0 + $0x18] sm:$0xff] }
   0x8   :  { %v23_v27 = vld [vmem:[%s539_s0 + $0x48] sm:$0xff]  ;;  %v24_v29 = vld [vmem:[%s539_s0 + $0x50] sm:$0xff]  ;;  %v25_v31 = vld [vmem:[%s539_s0 + $0x58] sm:$0xff] }
   0x9   :  { %330 = vmatpush3.bf16.msra.mxu0 %v327_v5  ;;  %364 = vmatpush3.bf16.msra.mxu1 %v327_v5  ;;  %v18_v32 = vld [vmem:[%s539_s0 + $0x20] sm:$0xff]  ;;  %v19_v34 = vld [vmem:[%s539_s0 + $0x28] sm:$0xff]  ;;  %v20_v36 = vld [vmem:[%s539_s0 + $0x30] sm:$0xff] }
   0xa   :  { %332 = vmatprep.subr.bf16.mxu0 %v331_v8  ;;  %357 = vmatprep.subr.bf16.mxu1 %v331_v8  ;;  %v26_v33 = vld [vmem:[%s539_s0 + $0x60] sm:$0xff]  ;;  %v27_v35 = vld [vmem:[%s539_s0 + $0x68] sm:$0xff]  ;;  %v28_v37 = vld [vmem:[%s539_s0 + $0x70] sm:$0xff] }
   0xb   :  { %v21_v38 = vld [vmem:[%s539_s0 + $0x38] sm:$0xff]  ;;  %v234_v40 = vld [vmem:[%s540_s2] ss:$0 sm:$0xff] }
   0xc   :  { %v29_v39 = vld [vmem:[%s539_s0 + $0x78] sm:$0xff] }
   0xd   :  { %334 = vmatpush3.bf16.msra.mxu0 %v331_v8  ;;  %365 = vmatpush3.bf16.msra.mxu1 %v331_v8 }
   0xe   :  { %336 = vmatprep.subr.bf16.mxu0 %v335_v13  ;;  %358 = vmatprep.subr.bf16.mxu1 %v335_v13 }
  0x11   :  { %338 = vmatpush3.bf16.msra.mxu0 %v335_v13  ;;  %366 = vmatpush3.bf16.msra.mxu1 %v335_v13 }
  0x12   :  { %340 = vmatprep.subr.bf16.mxu0 %v339_v16  ;;  %359 = vmatprep.subr.bf16.mxu1 %v339_v16 }
  0x15   :  { %342 = vmatpush3.bf16.msra.mxu0 %v339_v16  ;;  %367 = vmatpush3.bf16.msra.mxu1 %v339_v16 }
  0x16   :  { %344 = vmatprep.subr.bf16.mxu0 %v343_v19  ;;  %360 = vmatprep.subr.bf16.mxu1 %v343_v19 }
  0x19   :  { %346 = vmatpush3.bf16.msra.mxu0 %v343_v19  ;;  %368 = vmatpush3.bf16.msra.mxu1 %v343_v19 }
  0x1a   :  { %348 = vmatprep.subr.bf16.mxu0 %v347_v22  ;;  %361 = vmatprep.subr.bf16.mxu1 %v347_v22 }
  0x1d   :  { %350 = vmatpush3.bf16.msra.mxu0 %v347_v22  ;;  %369 = vmatpush3.bf16.msra.mxu1 %v347_v22 }
  0x1e   :  { %352 = vmatprep.subr.bf16.mxu0 %v351_v25  ;;  %362 = vmatprep.subr.bf16.mxu1 %v351_v25 }
  0x21   :  { %354 = vmatpush3.bf16.msra.mxu0 %v351_v25  ;;  %370 = vmatpush3.bf16.msra.mxu1 %v351_v25 }
  0x24   :  { %300 = vmatmul.mubr.f32.vlgmr.msra.gmra.mrb[0].mxu0 %v15_v26  ;;  %312 = vmatmul.mubr.f32.vlgmr.msra.gmra.mrb[0].mxu1 %v23_v27 }
  0x25   :  { %302 = vmatprep.mubr.f32.mxu0 %v16_v28  ;;  %314 = vmatprep.mubr.f32.mxu1 %v24_v29 }
  0x28   :  { %303 = vmatmul.mubr.f32.gmra.mrb[2].mxu0 %v17_v30  ;;  %315 = vmatmul.mubr.f32.gmra.mrb[2].mxu1 %v25_v31 }
  0x29   :  { %305 = vmatprep.mubr.f32.mxu0 %v18_v32  ;;  %317 = vmatprep.mubr.f32.mxu1 %v26_v33 }
  0x2c   :  { %306 = vmatmul.mubr.f32.gmra.mrb[4].mxu0 %v19_v34  ;;  %318 = vmatmul.mubr.f32.gmra.mrb[4].mxu1 %v27_v35 }
  0x2d   :  { %308 = vmatprep.mubr.f32.mxu0 %v20_v36  ;;  %320 = vmatprep.mubr.f32.mxu1 %v28_v37 }
  0x30   :  { %309 = vmatmul.mubr.f32.gmra.mrb[6].mxu0 %v21_v38  ;;  %321 = vmatmul.mubr.f32.gmra.mrb[6].mxu1 %v29_v39 }
  0xf7   :  { %v301_v41 = vpop.f32.mrb[0].mxu0  ;;  %v313_v42 = vpop.f32.mrb[0].mxu1 }
  0xf8   :  { %v125_v43 = vadd.f32 %v301_v41, %v234_v40  ;;  %v165_v44 = vadd.f32 %v313_v42, %v234_v40  ;;  %v119_v45 = vpop.f32.mrb[1].mxu0  ;;  %v159_v46 = vpop.f32.mrb[1].mxu1 }
  0xf9   :  { %v120_v47 = vadd.f32 %v234_v40, %v119_v45  ;;  %v160_v48 = vadd.f32 %v234_v40, %v159_v46 }
  0xfa   :  { %v199_v49 = vmax.f32 %v125_v43, 0.0  ;;  %v207_v50 = vmax.f32 %v165_v44, 0.0 }
  0xfb   :  { %v198_v51 = vmax.f32 %v120_v47, 0.0  ;;  %v206_v52 = vmax.f32 %v160_v48, 0.0  ;;  %v304_v53 = vpop.f32.mrb[2].mxu0  ;;  %v316_v54 = vpop.f32.mrb[2].mxu1 }
  0xfc   :  { %215 = vst [vmem:[%s541_s3 + $0x8] sm:$0xff] %v199_v49  ;;  %223 = vst [vmem:[%s541_s3 + $0x48] sm:$0xff] %v207_v50  ;;  %v135_v55 = vadd.f32 %v304_v53, %v234_v40  ;;  %v175_v56 = vadd.f32 %v316_v54, %v234_v40  ;;  %v129_v57 = vpop.f32.mrb[3].mxu0  ;;  %v169_v58 = vpop.f32.mrb[3].mxu1 }
  0xfd   :  { %214 = vst [vmem:[%s541_s3] sm:$0xff] %v198_v51  ;;  %222 = vst [vmem:[%s541_s3 + $0x40] sm:$0xff] %v206_v52  ;;  %v130_v59 = vadd.f32 %v234_v40, %v129_v57  ;;  %v170_v60 = vadd.f32 %v234_v40, %v169_v58 }
  0xfe   :  { %v201_v61 = vmax.f32 %v135_v55, 0.0  ;;  %v209_v62 = vmax.f32 %v175_v56, 0.0 }
  0xff   :  { %v200_v63 = vmax.f32 %v130_v59, 0.0  ;;  %v208_v0 = vmax.f32 %v170_v60, 0.0  ;;  %v307_v1 = vpop.f32.mrb[4].mxu0  ;;  %v319_v2 = vpop.f32.mrb[4].mxu1 }
 0x100   :  { %217 = vst [vmem:[%s541_s3 + $0x18] sm:$0xff] %v201_v61  ;;  %225 = vst [vmem:[%s541_s3 + $0x58] sm:$0xff] %v209_v62  ;;  %v145_v3 = vadd.f32 %v307_v1, %v234_v40  ;;  %v185_v4 = vadd.f32 %v319_v2, %v234_v40  ;;  %v139_v5 = vpop.f32.mrb[5].mxu0  ;;  %v179_v6 = vpop.f32.mrb[5].mxu1 }
 0x101   :  { %216 = vst [vmem:[%s541_s3 + $0x10] sm:$0xff] %v200_v63  ;;  %224 = vst [vmem:[%s541_s3 + $0x50] sm:$0xff] %v208_v0  ;;  %v140_v7 = vadd.f32 %v234_v40, %v139_v5  ;;  %v180_v8 = vadd.f32 %v234_v40, %v179_v6 }
 0x102   :  { %v203_v9 = vmax.f32 %v145_v3, 0.0  ;;  %v211_v10 = vmax.f32 %v185_v4, 0.0 }
 0x103   :  { %v202_v11 = vmax.f32 %v140_v7, 0.0  ;;  %v210_v12 = vmax.f32 %v180_v8, 0.0  ;;  %v310_v13 = vpop.f32.mrb[6].mxu0  ;;  %v322_v14 = vpop.f32.mrb[6].mxu1 }
 0x104   :  { %219 = vst [vmem:[%s541_s3 + $0x28] sm:$0xff] %v203_v9  ;;  %227 = vst [vmem:[%s541_s3 + $0x68] sm:$0xff] %v211_v10  ;;  %v155_v15 = vadd.f32 %v310_v13, %v234_v40  ;;  %v195_v16 = vadd.f32 %v322_v14, %v234_v40  ;;  %v149_v17 = vpop.f32.mrb[7].mxu0  ;;  %v189_v18 = vpop.f32.mrb[7].mxu1 }
 0x105   :  { %218 = vst [vmem:[%s541_s3 + $0x20] sm:$0xff] %v202_v11  ;;  %226 = vst [vmem:[%s541_s3 + $0x60] sm:$0xff] %v210_v12  ;;  %v150_v19 = vadd.f32 %v234_v40, %v149_v17  ;;  %v190_v20 = vadd.f32 %v234_v40, %v189_v18 }
 0x106   :  { %v205_v21 = vmax.f32 %v155_v15, 0.0  ;;  %v213_v22 = vmax.f32 %v195_v16, 0.0 }
 0x107   :  { %v204_v23 = vmax.f32 %v150_v19, 0.0  ;;  %v212_v24 = vmax.f32 %v190_v20, 0.0 }
 0x108   :  { %221 = vst [vmem:[%s541_s3 + $0x38] sm:$0xff] %v205_v21  ;;  %229 = vst [vmem:[%s541_s3 + $0x78] sm:$0xff] %v213_v22 }
 0x109   :  { %220 = vst [vmem:[%s541_s3 + $0x30] sm:$0xff] %v204_v23  ;;  %228 = vst [vmem:[%s541_s3 + $0x70] sm:$0xff] %v212_v24 }

// kernel: gcnnet_forward.8
= control target key start
LH: loop header
LB: loop body
LE: loop exit
PB: predicated region body
PF: predicated region fallthrough
CT: control target
= control target key end

     0   :  { %s630_s1 = inlined_call_operand.vmem [shape: f32[128,128], index: 1, kind: input, shape index: {}]   ;;  %s631_s2 = inlined_call_operand.vmem [shape: f32[1,128], index: 2, kind: input, shape index: {}]   ;;  %s632_s0 = inlined_call_operand.vmem [shape: f32[128,128], index: 0, kind: input, shape index: {}]   ;;  %s633_s3 = inlined_call_operand.vmem [shape: bf16[128,128], index: 3, kind: output, shape index: {}]  }
   0x1   :  { %v30_v0 = vld [vmem:[%s630_s1] sm:$0xff]  ;;  %v31_v1 = vld [vmem:[%s630_s1 + $0x8] sm:$0xff]  ;;  %v32_v2 = vld [vmem:[%s630_s1 + $0x10] sm:$0xff] }
   0x2   :  { %v442_v3 = vpack.c.bf16 %v31_v1, %v30_v0  ;;  %v33_v4 = vld [vmem:[%s630_s1 + $0x18] sm:$0xff]  ;;  %v34_v6 = vld [vmem:[%s630_s1 + $0x20] sm:$0xff]  ;;  %v35_v7 = vld [vmem:[%s630_s1 + $0x28] sm:$0xff] }
   0x3   :  { %v446_v5 = vpack.c.bf16 %v33_v4, %v32_v2  ;;  %v450_v8 = vpack.c.bf16 %v35_v7, %v34_v6  ;;  %v14_v9 = vld [vmem:[%s632_s0] sm:$0xff]  ;;  %v36_v11 = vld [vmem:[%s630_s1 + $0x30] sm:$0xff]  ;;  %v37_v12 = vld [vmem:[%s630_s1 + $0x38] sm:$0xff] }
   0x4   :  { %443 = vmatprep.subr.bf16.mxu0 %v442_v3  ;;  %474 = vmatprep.subr.bf16.mxu1 %v442_v3  ;;  %v22_v10 = vld [vmem:[%s632_s0 + $0x40] sm:$0xff]  ;;  %v454_v13 = vpack.c.bf16 %v37_v12, %v36_v11  ;;  %v39_v15 = vld [vmem:[%s630_s1 + $0x48] sm:$0xff]  ;;  %v40_v17 = vld [vmem:[%s630_s1 + $0x50] sm:$0xff] }
   0x5   :  { %445 = vmatpush3.bf16.msra.mxu0 %v442_v3  ;;  %482 = vmatpush3.bf16.msra.mxu1 %v442_v3  ;;  %v38_v14 = vld [vmem:[%s630_s1 + $0x40] sm:$0xff]  ;;  %v41_v18 = vld [vmem:[%s630_s1 + $0x58] sm:$0xff]  ;;  %v43_v21 = vld [vmem:[%s630_s1 + $0x68] sm:$0xff] }
   0x6   :  { %447 = vmatprep.subr.bf16.mxu0 %v446_v5  ;;  %475 = vmatprep.subr.bf16.mxu1 %v446_v5  ;;  %v458_v16 = vpack.c.bf16 %v39_v15, %v38_v14  ;;  %v462_v19 = vpack.c.bf16 %v41_v18, %v40_v17  ;;  %v42_v20 = vld [vmem:[%s630_s1 + $0x60] sm:$0xff]  ;;  %v44_v23 = vld [vmem:[%s630_s1 + $0x70] sm:$0xff]  ;;  %v45_v24 = vld [vmem:[%s630_s1 + $0x78] sm:$0xff] }
   0x7   :  { %418 = vmatprep.mubr.f32.mxu0 %v14_v9  ;;  %430 = vmatprep.mubr.f32.mxu1 %v22_v10  ;;  %v466_v22 = vpack.c.bf16 %v43_v21, %v42_v20  ;;  %v470_v25 = vpack.c.bf16 %v45_v24, %v44_v23  ;;  %v15_v26 = vld [vmem:[%s632_s0 + $0x8] sm:$0xff]  ;;  %v16_v28 = vld [vmem:[%s632_s0 + $0x10] sm:$0xff]  ;;  %v17_v30 = vld [vmem:[%s632_s0 + $0x18] sm:$0xff] }
   0x8   :  { %v23_v27 = vld [vmem:[%s632_s0 + $0x48] sm:$0xff]  ;;  %v24_v29 = vld [vmem:[%s632_s0 + $0x50] sm:$0xff]  ;;  %v25_v31 = vld [vmem:[%s632_s0 + $0x58] sm:$0xff] }
   0x9   :  { %449 = vmatpush3.bf16.msra.mxu0 %v446_v5  ;;  %483 = vmatpush3.bf16.msra.mxu1 %v446_v5  ;;  %v18_v32 = vld [vmem:[%s632_s0 + $0x20] sm:$0xff]  ;;  %v19_v34 = vld [vmem:[%s632_s0 + $0x28] sm:$0xff]  ;;  %v20_v36 = vld [vmem:[%s632_s0 + $0x30] sm:$0xff] }
   0xa   :  { %451 = vmatprep.subr.bf16.mxu0 %v450_v8  ;;  %476 = vmatprep.subr.bf16.mxu1 %v450_v8  ;;  %v26_v33 = vld [vmem:[%s632_s0 + $0x60] sm:$0xff]  ;;  %v27_v35 = vld [vmem:[%s632_s0 + $0x68] sm:$0xff]  ;;  %v28_v37 = vld [vmem:[%s632_s0 + $0x70] sm:$0xff] }
   0xb   :  { %v21_v38 = vld [vmem:[%s632_s0 + $0x38] sm:$0xff] }
   0xc   :  { %v29_v39 = vld [vmem:[%s632_s0 + $0x78] sm:$0xff] }
   0xd   :  { %453 = vmatpush3.bf16.msra.mxu0 %v450_v8  ;;  %484 = vmatpush3.bf16.msra.mxu1 %v450_v8 }
   0xe   :  { %455 = vmatprep.subr.bf16.mxu0 %v454_v13  ;;  %477 = vmatprep.subr.bf16.mxu1 %v454_v13 }
  0x11   :  { %457 = vmatpush3.bf16.msra.mxu0 %v454_v13  ;;  %485 = vmatpush3.bf16.msra.mxu1 %v454_v13 }
  0x12   :  { %459 = vmatprep.subr.bf16.mxu0 %v458_v16  ;;  %478 = vmatprep.subr.bf16.mxu1 %v458_v16 }
  0x15   :  { %461 = vmatpush3.bf16.msra.mxu0 %v458_v16  ;;  %486 = vmatpush3.bf16.msra.mxu1 %v458_v16 }
  0x16   :  { %463 = vmatprep.subr.bf16.mxu0 %v462_v19  ;;  %479 = vmatprep.subr.bf16.mxu1 %v462_v19 }
  0x19   :  { %465 = vmatpush3.bf16.msra.mxu0 %v462_v19  ;;  %487 = vmatpush3.bf16.msra.mxu1 %v462_v19 }
  0x1a   :  { %467 = vmatprep.subr.bf16.mxu0 %v466_v22  ;;  %480 = vmatprep.subr.bf16.mxu1 %v466_v22 }
  0x1d   :  { %469 = vmatpush3.bf16.msra.mxu0 %v466_v22  ;;  %488 = vmatpush3.bf16.msra.mxu1 %v466_v22 }
  0x1e   :  { %471 = vmatprep.subr.bf16.mxu0 %v470_v25  ;;  %481 = vmatprep.subr.bf16.mxu1 %v470_v25 }
  0x21   :  { %473 = vmatpush3.bf16.msra.mxu0 %v470_v25  ;;  %489 = vmatpush3.bf16.msra.mxu1 %v470_v25 }
  0x24   :  { %419 = vmatmul.mubr.f32.vlgmr.msra.gmra.mrb[0].mxu0 %v15_v26  ;;  %431 = vmatmul.mubr.f32.vlgmr.msra.gmra.mrb[0].mxu1 %v23_v27 }
  0x25   :  { %421 = vmatprep.mubr.f32.mxu0 %v16_v28  ;;  %433 = vmatprep.mubr.f32.mxu1 %v24_v29 }
  0x28   :  { %422 = vmatmul.mubr.f32.gmra.mrb[2].mxu0 %v17_v30  ;;  %434 = vmatmul.mubr.f32.gmra.mrb[2].mxu1 %v25_v31 }
  0x29   :  { %424 = vmatprep.mubr.f32.mxu0 %v18_v32  ;;  %436 = vmatprep.mubr.f32.mxu1 %v26_v33 }
  0x2c   :  { %425 = vmatmul.mubr.f32.gmra.mrb[4].mxu0 %v19_v34  ;;  %437 = vmatmul.mubr.f32.gmra.mrb[4].mxu1 %v27_v35 }
  0x2d   :  { %427 = vmatprep.mubr.f32.mxu0 %v20_v36  ;;  %439 = vmatprep.mubr.f32.mxu1 %v28_v37 }
  0x30   :  { %428 = vmatmul.mubr.f32.gmra.mrb[6].mxu0 %v21_v38  ;;  %440 = vmatmul.mubr.f32.gmra.mrb[6].mxu1 %v29_v39 }
  0xf7   :  { %v420_v40 = vpop.f32.mrb[0].mxu0  ;;  %v432_v41 = vpop.f32.mrb[0].mxu1 }
  0xf8   :  { %v112_v42 = vpop.f32.mrb[1].mxu0  ;;  %v152_v43 = vpop.f32.mrb[1].mxu1 }
  0xf9   :  { %v310_v44 = vpack.c.bf16 %v420_v40, %v112_v42  ;;  %v330_v45 = vpack.c.bf16 %v432_v41, %v152_v43 }
  0xfb   :  { %311 = vst [vmem:[%s633_s3] sm:$0xff] %v310_v44   ;;  %350 = vst [vmem:[%s633_s3 + $0x20] sm:$0xff] %v330_v45   ;;  %v423_v46 = vpop.f32.mrb[2].mxu0  ;;  %v435_v47 = vpop.f32.mrb[2].mxu1 }
  0xfc   :  { %v122_v48 = vpop.f32.mrb[3].mxu0  ;;  %v162_v49 = vpop.f32.mrb[3].mxu1 }
  0xfd   :  { %v315_v50 = vpack.c.bf16 %v423_v46, %v122_v48  ;;  %v335_v51 = vpack.c.bf16 %v435_v47, %v162_v49 }
  0xff   :  { %347 = vst [vmem:[%s633_s3 + $0x8] sm:$0xff] %v315_v50   ;;  %351 = vst [vmem:[%s633_s3 + $0x28] sm:$0xff] %v335_v51   ;;  %v426_v52 = vpop.f32.mrb[4].mxu0  ;;  %v438_v53 = vpop.f32.mrb[4].mxu1 }
 0x100   :  { %v132_v54 = vpop.f32.mrb[5].mxu0  ;;  %v172_v55 = vpop.f32.mrb[5].mxu1 }
 0x101   :  { %v320_v56 = vpack.c.bf16 %v426_v52, %v132_v54  ;;  %v340_v57 = vpack.c.bf16 %v438_v53, %v172_v55 }
 0x103   :  { %348 = vst [vmem:[%s633_s3 + $0x10] sm:$0xff] %v320_v56   ;;  %352 = vst [vmem:[%s633_s3 + $0x30] sm:$0xff] %v340_v57   ;;  %v429_v58 = vpop.f32.mrb[6].mxu0  ;;  %v441_v59 = vpop.f32.mrb[6].mxu1 }
 0x104   :  { %v142_v60 = vpop.f32.mrb[7].mxu0  ;;  %v182_v61 = vpop.f32.mrb[7].mxu1 }
 0x105   :  { %v325_v62 = vpack.c.bf16 %v429_v58, %v142_v60  ;;  %v345_v63 = vpack.c.bf16 %v441_v59, %v182_v61 }
 0x107   :  { %349 = vst [vmem:[%s633_s3 + $0x18] sm:$0xff] %v325_v62   ;;  %353 = vst [vmem:[%s633_s3 + $0x38] sm:$0xff] %v345_v63  }

// kernel: gcnnet_forward.9
= control target key start
LH: loop header
LB: loop body
LE: loop exit
PB: predicated region body
PF: predicated region fallthrough
CT: control target
= control target key end

     0   :  { %s602_s1 = inlined_call_operand.vmem [shape: bf16[128,128], index: 1, kind: input, shape index: {}]   ;;  %s603_s0 = inlined_call_operand.vmem [shape: bf16[128,128], index: 0, kind: input, shape index: {}]   ;;  %s604_s2 = inlined_call_operand.vmem [shape: f32[1,128], index: 2, kind: input, shape index: {}]   ;;  %s605_s3 = inlined_call_operand.vmem [shape: f32[128,128], index: 3, kind: output, shape index: {}]  }
   0x1   :  { %v467_v0 = vld [vmem:[%s602_s1] sm:$0xff]   ;;  %v468_v1 = vld [vmem:[%s602_s1 + $0x8] sm:$0xff]   ;;  %v469_v2 = vld [vmem:[%s602_s1 + $0x10] sm:$0xff]  }
   0x2   :  { %419 = vmatprep.subr.bf16.mxu0 %v467_v0  ;;  %451 = vmatprep.subr.bf16.mxu1 %v467_v0  ;;  %v470_v3 = vld [vmem:[%s602_s1 + $0x18] sm:$0xff]   ;;  %v475_v4 = vld [vmem:[%s603_s0] sm:$0xff]   ;;  %v472_v7 = vld [vmem:[%s602_s1 + $0x28] sm:$0xff]  }
   0x3   :  { %420 = vmatpush3.bf16.msra.mxu0 %v467_v0  ;;  %459 = vmatpush3.bf16.msra.mxu1 %v467_v0  ;;  %v476_v5 = vld [vmem:[%s603_s0 + $0x20] sm:$0xff]   ;;  %v473_v8 = vld [vmem:[%s602_s1 + $0x30] sm:$0xff]   ;;  %v474_v9 = vld [vmem:[%s602_s1 + $0x38] sm:$0xff]  }
   0x4   :  { %421 = vmatprep.subr.bf16.mxu0 %v468_v1  ;;  %452 = vmatprep.subr.bf16.mxu1 %v468_v1  ;;  %v471_v6 = vld [vmem:[%s602_s1 + $0x20] sm:$0xff]   ;;  %v477_v10 = vld [vmem:[%s603_s0 + $0x8] sm:$0xff]   ;;  %v479_v12 = vld [vmem:[%s603_s0 + $0x10] sm:$0xff]  }
   0x5   :  { %435 = vmatprep.mubr.bf16.mxu0 %v475_v4  ;;  %443 = vmatprep.mubr.bf16.mxu1 %v476_v5  ;;  %v478_v11 = vld [vmem:[%s603_s0 + $0x28] sm:$0xff]   ;;  %v480_v13 = vld [vmem:[%s603_s0 + $0x30] sm:$0xff]   ;;  %v481_v14 = vld [vmem:[%s603_s0 + $0x18] sm:$0xff]  }
   0x6   :  { %v482_v15 = vld [vmem:[%s603_s0 + $0x38] sm:$0xff]   ;;  %v402_v16 = vld [vmem:[%s604_s2] ss:$0 sm:$0xff] }
   0x7   :  { %422 = vmatpush3.bf16.msra.mxu0 %v468_v1  ;;  %460 = vmatpush3.bf16.msra.mxu1 %v468_v1 }
   0x8   :  { %423 = vmatprep.subr.bf16.mxu0 %v469_v2  ;;  %453 = vmatprep.subr.bf16.mxu1 %v469_v2 }
   0xb   :  { %424 = vmatpush3.bf16.msra.mxu0 %v469_v2  ;;  %461 = vmatpush3.bf16.msra.mxu1 %v469_v2 }
   0xc   :  { %425 = vmatprep.subr.bf16.mxu0 %v470_v3  ;;  %454 = vmatprep.subr.bf16.mxu1 %v470_v3 }
   0xf   :  { %426 = vmatpush3.bf16.msra.mxu0 %v470_v3  ;;  %462 = vmatpush3.bf16.msra.mxu1 %v470_v3 }
  0x10   :  { %427 = vmatprep.subr.bf16.mxu0 %v471_v6  ;;  %455 = vmatprep.subr.bf16.mxu1 %v471_v6 }
  0x13   :  { %428 = vmatpush3.bf16.msra.mxu0 %v471_v6  ;;  %463 = vmatpush3.bf16.msra.mxu1 %v471_v6 }
  0x14   :  { %429 = vmatprep.subr.bf16.mxu0 %v472_v7  ;;  %456 = vmatprep.subr.bf16.mxu1 %v472_v7 }
  0x17   :  { %430 = vmatpush3.bf16.msra.mxu0 %v472_v7  ;;  %464 = vmatpush3.bf16.msra.mxu1 %v472_v7 }
  0x18   :  { %431 = vmatprep.subr.bf16.mxu0 %v473_v8  ;;  %457 = vmatprep.subr.bf16.mxu1 %v473_v8 }
  0x1b   :  { %432 = vmatpush3.bf16.msra.mxu0 %v473_v8  ;;  %465 = vmatpush3.bf16.msra.mxu1 %v473_v8 }
  0x1c   :  { %433 = vmatprep.subr.bf16.mxu0 %v474_v9  ;;  %458 = vmatprep.subr.bf16.mxu1 %v474_v9 }
  0x1f   :  { %434 = vmatpush3.bf16.msra.mxu0 %v474_v9  ;;  %466 = vmatpush3.bf16.msra.mxu1 %v474_v9 }
  0x22   :  { %436 = vmatmul.mubr.bf16.vlgmr.msra.gmra.mrb[0].mxu0 %v477_v10  ;;  %444 = vmatmul.mubr.bf16.vlgmr.msra.gmra.mrb[0].mxu1 %v478_v11 }
  0x23   :  { %439 = vmatprep.mubr.bf16.mxu0 %v479_v12  ;;  %447 = vmatprep.mubr.bf16.mxu1 %v480_v13 }
  0x2a   :  { %440 = vmatmul.mubr.bf16.gmra.mrb[4].mxu0 %v481_v14  ;;  %448 = vmatmul.mubr.bf16.gmra.mrb[4].mxu1 %v482_v15 }
  0xf5   :  { %v437_v17 = vpop.f32.mrb[0].mxu0  ;;  %v445_v18 = vpop.f32.mrb[0].mxu1 }
  0xf6   :  { %v336_v19 = vadd.f32 %v437_v17, %v402_v16  ;;  %v344_v20 = vadd.f32 %v445_v18, %v402_v16  ;;  %v213_v21 = vpop.f32.mrb[1].mxu0  ;;  %v245_v22 = vpop.f32.mrb[1].mxu1 }
  0xf7   :  { %v334_v23 = vadd.f32 %v402_v16, %v213_v21  ;;  %v342_v24 = vadd.f32 %v402_v16, %v245_v22  ;;  %v438_v25 = vpop.f32.mrb[2].mxu0  ;;  %v446_v26 = vpop.f32.mrb[2].mxu1 }
  0xf8   :  { %v352_v27 = vmax.f32 %v336_v19, 0.0  ;;  %v360_v28 = vmax.f32 %v344_v20, 0.0  ;;  %v337_v29 = vadd.f32 %v438_v25, %v402_v16  ;;  %v345_v30 = vadd.f32 %v446_v26, %v402_v16  ;;  %v216_v31 = vpop.f32.mrb[3].mxu0  ;;  %v248_v32 = vpop.f32.mrb[3].mxu1 }
  0xf9   :  { %v350_v33 = vmax.f32 %v334_v23, 0.0  ;;  %v358_v34 = vmax.f32 %v342_v24, 0.0  ;;  %v335_v35 = vadd.f32 %v402_v16, %v216_v31  ;;  %v343_v36 = vadd.f32 %v402_v16, %v248_v32 }
  0xfa   :  { %368 = vst [vmem:[%s605_s3 + $0x10] sm:$0xff] %v352_v27  ;;  %376 = vst [vmem:[%s605_s3 + $0x50] sm:$0xff] %v360_v28  ;;  %v353_v37 = vmax.f32 %v337_v29, 0.0  ;;  %v361_v38 = vmax.f32 %v345_v30, 0.0 }
  0xfb   :  { %366 = vst [vmem:[%s605_s3] sm:$0xff] %v350_v33  ;;  %374 = vst [vmem:[%s605_s3 + $0x40] sm:$0xff] %v358_v34  ;;  %v351_v39 = vmax.f32 %v335_v35, 0.0  ;;  %v359_v40 = vmax.f32 %v343_v36, 0.0 }
  0xfc   :  { %369 = vst [vmem:[%s605_s3 + $0x18] sm:$0xff] %v353_v37  ;;  %377 = vst [vmem:[%s605_s3 + $0x58] sm:$0xff] %v361_v38 }
  0xfd   :  { %367 = vst [vmem:[%s605_s3 + $0x8] sm:$0xff] %v351_v39  ;;  %375 = vst [vmem:[%s605_s3 + $0x48] sm:$0xff] %v359_v40  ;;  %v441_v41 = vpop.f32.mrb[4].mxu0  ;;  %v449_v42 = vpop.f32.mrb[4].mxu1 }
  0xfe   :  { %v340_v43 = vadd.f32 %v441_v41, %v402_v16  ;;  %v348_v44 = vadd.f32 %v449_v42, %v402_v16  ;;  %v229_v45 = vpop.f32.mrb[5].mxu0  ;;  %v261_v46 = vpop.f32.mrb[5].mxu1 }
  0xff   :  { %v338_v47 = vadd.f32 %v402_v16, %v229_v45  ;;  %v346_v48 = vadd.f32 %v402_v16, %v261_v46  ;;  %v442_v49 = vpop.f32.mrb[6].mxu0  ;;  %v450_v50 = vpop.f32.mrb[6].mxu1 }
 0x100   :  { %v356_v51 = vmax.f32 %v340_v43, 0.0  ;;  %v364_v52 = vmax.f32 %v348_v44, 0.0  ;;  %v341_v53 = vadd.f32 %v442_v49, %v402_v16  ;;  %v349_v54 = vadd.f32 %v450_v50, %v402_v16  ;;  %v232_v55 = vpop.f32.mrb[7].mxu0  ;;  %v264_v56 = vpop.f32.mrb[7].mxu1 }
 0x101   :  { %v354_v57 = vmax.f32 %v338_v47, 0.0  ;;  %v362_v58 = vmax.f32 %v346_v48, 0.0  ;;  %v339_v59 = vadd.f32 %v402_v16, %v232_v55  ;;  %v347_v60 = vadd.f32 %v402_v16, %v264_v56 }
 0x102   :  { %372 = vst [vmem:[%s605_s3 + $0x30] sm:$0xff] %v356_v51  ;;  %380 = vst [vmem:[%s605_s3 + $0x70] sm:$0xff] %v364_v52  ;;  %v357_v61 = vmax.f32 %v341_v53, 0.0  ;;  %v365_v62 = vmax.f32 %v349_v54, 0.0 }
 0x103   :  { %370 = vst [vmem:[%s605_s3 + $0x20] sm:$0xff] %v354_v57  ;;  %378 = vst [vmem:[%s605_s3 + $0x60] sm:$0xff] %v362_v58  ;;  %v355_v63 = vmax.f32 %v339_v59, 0.0  ;;  %v363_v0 = vmax.f32 %v347_v60, 0.0 }
 0x104   :  { %373 = vst [vmem:[%s605_s3 + $0x38] sm:$0xff] %v357_v61  ;;  %381 = vst [vmem:[%s605_s3 + $0x78] sm:$0xff] %v365_v62 }
 0x105   :  { %371 = vst [vmem:[%s605_s3 + $0x28] sm:$0xff] %v355_v63  ;;  %379 = vst [vmem:[%s605_s3 + $0x68] sm:$0xff] %v363_v0 }

// kernel: gcnnet_forward.11
= control target key start
LH: loop header
LB: loop body
LE: loop exit
PB: predicated region body
PF: predicated region fallthrough
CT: control target
= control target key end

     0   :  { %v366_v16 = vlaneseq  ;;  %s986_s1 = inlined_call_operand.vmem [shape: bf16[128,128], index: 1, kind: input, shape index: {}]   ;;  %s987_s0 = inlined_call_operand.vmem [shape: bf16[128,128], index: 0, kind: input, shape index: {}]   ;;  %s988_s2 = inlined_call_operand.vmem [shape: f32[1,128], index: 2, kind: input, shape index: {}]   ;;  %s989_s3 = inlined_call_operand.vmem [shape: f32[128,128], index: 3, kind: output, shape index: {}]  }
   0x1   :  { %v646_v0 = vld [vmem:[%s986_s1] sm:$0xff]   ;;  %v647_v1 = vld [vmem:[%s986_s1 + $0x8] sm:$0xff]   ;;  %v648_v2 = vld [vmem:[%s986_s1 + $0x10] sm:$0xff]  }
   0x2   :  { %598 = vmatprep.subr.bf16.mxu0 %v646_v0  ;;  %630 = vmatprep.subr.bf16.mxu1 %v646_v0  ;;  %v649_v3 = vld [vmem:[%s986_s1 + $0x18] sm:$0xff]   ;;  %v654_v4 = vld [vmem:[%s987_s0] sm:$0xff]   ;;  %v651_v7 = vld [vmem:[%s986_s1 + $0x28] sm:$0xff]   ;;  %v799_v18 = vand.u32 127, %v366_v16 }
   0x3   :  { %599 = vmatpush3.bf16.msra.mxu0 %v646_v0  ;;  %638 = vmatpush3.bf16.msra.mxu1 %v646_v0  ;;  %v655_v5 = vld [vmem:[%s987_s0 + $0x20] sm:$0xff]   ;;  %v652_v8 = vld [vmem:[%s986_s1 + $0x30] sm:$0xff]   ;;  %v653_v9 = vld [vmem:[%s986_s1 + $0x38] sm:$0xff]  }
   0x4   :  { %600 = vmatprep.subr.bf16.mxu0 %v647_v1  ;;  %631 = vmatprep.subr.bf16.mxu1 %v647_v1  ;;  %v650_v6 = vld [vmem:[%s986_s1 + $0x20] sm:$0xff]   ;;  %v656_v10 = vld [vmem:[%s987_s0 + $0x8] sm:$0xff]   ;;  %v658_v12 = vld [vmem:[%s987_s0 + $0x10] sm:$0xff]   ;;  %vm368_vm0 = vcmp.lt.s32.totalorder %v799_v18, 4 }
   0x5   :  { %614 = vmatprep.mubr.bf16.mxu0 %v654_v4  ;;  %622 = vmatprep.mubr.bf16.mxu1 %v655_v5  ;;  %v657_v11 = vld [vmem:[%s987_s0 + $0x28] sm:$0xff]   ;;  %v660_v13 = vld [vmem:[%s987_s0 + $0x30] sm:$0xff]   ;;  %v659_v14 = vld [vmem:[%s987_s0 + $0x18] sm:$0xff]  }
   0x6   :  { %v661_v15 = vld [vmem:[%s987_s0 + $0x38] sm:$0xff]   ;;  %v797_v17 = vld [vmem:[%s988_s2] ss:$0 sm:$0xff] }
   0x7   :  { %601 = vmatpush3.bf16.msra.mxu0 %v647_v1  ;;  %639 = vmatpush3.bf16.msra.mxu1 %v647_v1 }
   0x8   :  { %602 = vmatprep.subr.bf16.mxu0 %v648_v2  ;;  %632 = vmatprep.subr.bf16.mxu1 %v648_v2 }
   0xb   :  { %603 = vmatpush3.bf16.msra.mxu0 %v648_v2  ;;  %640 = vmatpush3.bf16.msra.mxu1 %v648_v2 }
   0xc   :  { %604 = vmatprep.subr.bf16.mxu0 %v649_v3  ;;  %633 = vmatprep.subr.bf16.mxu1 %v649_v3 }
   0xf   :  { %605 = vmatpush3.bf16.msra.mxu0 %v649_v3  ;;  %641 = vmatpush3.bf16.msra.mxu1 %v649_v3 }
  0x10   :  { %606 = vmatprep.subr.bf16.mxu0 %v650_v6  ;;  %634 = vmatprep.subr.bf16.mxu1 %v650_v6 }
  0x13   :  { %607 = vmatpush3.bf16.msra.mxu0 %v650_v6  ;;  %642 = vmatpush3.bf16.msra.mxu1 %v650_v6 }
  0x14   :  { %608 = vmatprep.subr.bf16.mxu0 %v651_v7  ;;  %635 = vmatprep.subr.bf16.mxu1 %v651_v7 }
  0x17   :  { %609 = vmatpush3.bf16.msra.mxu0 %v651_v7  ;;  %643 = vmatpush3.bf16.msra.mxu1 %v651_v7 }
  0x18   :  { %610 = vmatprep.subr.bf16.mxu0 %v652_v8  ;;  %636 = vmatprep.subr.bf16.mxu1 %v652_v8 }
  0x1b   :  { %611 = vmatpush3.bf16.msra.mxu0 %v652_v8  ;;  %644 = vmatpush3.bf16.msra.mxu1 %v652_v8 }
  0x1c   :  { %612 = vmatprep.subr.bf16.mxu0 %v653_v9  ;;  %637 = vmatprep.subr.bf16.mxu1 %v653_v9 }
  0x1f   :  { %613 = vmatpush3.bf16.msra.mxu0 %v653_v9  ;;  %645 = vmatpush3.bf16.msra.mxu1 %v653_v9 }
  0x22   :  { %615 = vmatmul.mubr.bf16.vlgmr.msra.gmra.mrb[0].mxu0 %v656_v10  ;;  %623 = vmatmul.mubr.bf16.vlgmr.msra.gmra.mrb[0].mxu1 %v657_v11 }
  0x23   :  { %618 = vmatprep.mubr.bf16.mxu0 %v658_v12  ;;  %626 = vmatprep.mubr.bf16.mxu1 %v660_v13 }
  0x2a   :  { %619 = vmatmul.mubr.bf16.gmra.mrb[4].mxu0 %v659_v14  ;;  %627 = vmatmul.mubr.bf16.gmra.mrb[4].mxu1 %v661_v15 }
  0xf5   :  { %v616_v19 = vpop.f32.mrb[0].mxu0  ;;  %v624_v20 = vpop.f32.mrb[0].mxu1 }
  0xf6   :  { %v336_v21 = vadd.f32 %v616_v19, %v797_v17  ;;  %v344_v22 = vadd.f32 %v624_v20, %v797_v17  ;;  %v213_v23 = vpop.f32.mrb[1].mxu0  ;;  %v245_v24 = vpop.f32.mrb[1].mxu1 }
  0xf7   :  { %v334_v25 = vadd.f32 %v797_v17, %v213_v23  ;;  %v617_v26 = vpop.f32.mrb[2].mxu0  ;;  %v625_v27 = vpop.f32.mrb[2].mxu1  ;;  %v342_v33 = vadd.f32 %v797_v17, %v245_v24 }
  0xf8   :  { %v352_v28 = vmax.f32 %v336_v21, 0.0  ;;  %v360_v29 = vmax.f32 %v344_v22, 0.0  ;;  %v337_v30 = vadd.f32 %v617_v26, %v797_v17  ;;  %v216_v31 = vpop.f32.mrb[3].mxu0  ;;  %v248_v32 = vpop.f32.mrb[3].mxu1  ;;  %v345_v34 = vadd.f32 %v625_v27, %v797_v17 }
  0xf9   :  { %v350_v35 = vmax.f32 %v334_v25, 0.0  ;;  %v358_v39 = vmax.f32 %v342_v33, 0.0  ;;  %v335_v43 = vadd.f32 %v797_v17, %v216_v31  ;;  %v343_v44 = vadd.f32 %v797_v17, %v248_v32 }
  0xfa   :  { %v353_v36 = vmax.f32 %v337_v30, 0.0  ;;  %v810_v37 = vsel %vm368_vm0, %v360_v29, -1e+30  ;;  %v814_v38 = vsel %vm368_vm0, %v352_v28, -1e+30  ;;  %v361_v40 = vmax.f32 %v345_v34, 0.0 }
  0xfb   :  { %405 = vmax.xlane.f32.xlu0 %v810_v37  ;;  %389 = vmax.xlane.f32.xlu1 %v814_v38  ;;  %v369_v45 = vsel %vm368_vm0, %v350_v35, -1e+30  ;;  %v351_v55 = vmax.f32 %v335_v43, 0.0  ;;  %v359_v56 = vmax.f32 %v343_v44, 0.0  ;;  %v377_v57 = vsel %vm368_vm0, %v358_v39, -1e+30 }
  0xfc   :  { %v372_v46 = vsel %vm368_vm0, %v353_v36, -1e+30  ;;  %v380_v58 = vsel %vm368_vm0, %v361_v40, -1e+30 }
  0xfd   :  { %v620_v41 = vpop.f32.mrb[4].mxu0  ;;  %v628_v42 = vpop.f32.mrb[4].mxu1  ;;  %v378_v62 = vsel %vm368_vm0, %v359_v56, -1e+30  ;;  %v370_v63 = vsel %vm368_vm0, %v351_v55, -1e+30 }
  0xfe   :  { %v229_v47 = vpop.f32.mrb[5].mxu0  ;;  %v261_v48 = vpop.f32.mrb[5].mxu1  ;;  %v340_v51 = vadd.f32 %v620_v41, %v797_v17  ;;  %v348_v9 = vadd.f32 %v628_v42, %v797_v17 }
  0xff   :  { %385 = vmax.xlane.f32.xlu0 %v369_v45  ;;  %391 = vmax.xlane.f32.xlu1 %v372_v46  ;;  %v621_v49 = vpop.f32.mrb[6].mxu0  ;;  %v629_v50 = vpop.f32.mrb[6].mxu1  ;;  %v338_v61 = vadd.f32 %v797_v17, %v229_v47  ;;  %v346_v1 = vadd.f32 %v797_v17, %v261_v48 }
 0x100   :  { %v341_v52 = vadd.f32 %v621_v49, %v797_v17  ;;  %v232_v53 = vpop.f32.mrb[7].mxu0  ;;  %v264_v54 = vpop.f32.mrb[7].mxu1  ;;  %v356_v59 = vmax.f32 %v340_v51, 0.0  ;;  %v349_v10 = vadd.f32 %v629_v50, %v797_v17  ;;  %v364_v15 = vmax.f32 %v348_v9, 0.0 }
 0x101   :  { %v339_v0 = vadd.f32 %v797_v17, %v232_v53  ;;  %v347_v4 = vadd.f32 %v797_v17, %v264_v54  ;;  %v354_v5 = vmax.f32 %v338_v61, 0.0  ;;  %v362_v7 = vmax.f32 %v346_v1, 0.0 }
 0x102   :  { %v357_v60 = vmax.f32 %v341_v52, 0.0  ;;  %v375_v2 = vsel %vm368_vm0, %v356_v59, -1e+30  ;;  %v365_v16 = vmax.f32 %v349_v10, 0.0  ;;  %v860_v17 = vsel %vm368_vm0, %v364_v15, -1e+30 }
 0x103   :  { %401 = vmax.xlane.f32.xlu0 %v377_v57  ;;  %407 = vmax.xlane.f32.xlu1 %v380_v58  ;;  %v355_v6 = vmax.f32 %v339_v0, 0.0  ;;  %v363_v8 = vmax.f32 %v347_v4, 0.0  ;;  %v373_v11 = vsel %vm368_vm0, %v354_v5, -1e+30  ;;  %v850_v13 = vsel %vm368_vm0, %v362_v7, -1e+30 }
 0x104   :  { %v376_v3 = vsel %vm368_vm0, %v357_v60, -1e+30  ;;  %v864_v19 = vsel %vm368_vm0, %v365_v16, -1e+30 }
 0x105   :  { %v374_v12 = vsel %vm368_vm0, %v355_v6, -1e+30  ;;  %v854_v14 = vsel %vm368_vm0, %v363_v8, -1e+30 }
 0x107   :  { %403 = vmax.xlane.f32.xlu1 %v378_v62  ;;  %387 = vmax.xlane.f32.xlu0 %v370_v63 }
 0x10b   :  { %397 = vmax.xlane.f32.xlu0 %v375_v2  ;;  %399 = vmax.xlane.f32.xlu1 %v376_v3 }
 0x10f   :  { %393 = vmax.xlane.f32.xlu0 %v373_v11  ;;  %395 = vmax.xlane.f32.xlu1 %v374_v12 }
 0x113   :  { %409 = vmax.xlane.f32.xlu0 %v850_v13  ;;  %411 = vmax.xlane.f32.xlu1 %v854_v14 }
 0x117   :  { %413 = vmax.xlane.f32.xlu0 %v860_v17  ;;  %415 = vmax.xlane.f32.xlu1 %v864_v19 }
 0x188   :  { %v406_v20 = vpop.xlane.xlu0 %405  ;;  %v390_v21 = vpop.xlane.xlu1 %389 }
 0x189   :  { %v869_v22 = vsub.f32 %v810_v37, %v406_v20  ;;  %v872_v23 = vsub.f32 %v814_v38, %v390_v21 }
 0x18b   :  { %v437_v24 = vmul.f32 1.442695, %v872_v23  ;;  %v453_v18 = vmul.f32 1.442695, %v869_v22 }
 0x18c   :  { %v386_v25 = vpop.xlane.xlu0 %385  ;;  %v392_v26 = vpop.xlane.xlu1 %391 }
 0x18d   :  { %v876_v27 = vsub.f32 %v369_v45, %v386_v25  ;;  %v878_v28 = vsub.f32 %v372_v46, %v392_v26  ;;  %662 = vpow2.f32 %v437_v24 }
 0x18e   :  { %664 = vpow2.f32 %v453_v18 }
 0x18f   :  { %v439_v29 = vmul.f32 1.442695, %v878_v28  ;;  %v433_v32 = vmul.f32 1.442695, %v876_v27 }
 0x190   :  { %v402_v30 = vpop.xlane.xlu0 %401  ;;  %v408_v31 = vpop.xlane.xlu1 %407 }
 0x191   :  { %v882_v33 = vsub.f32 %v377_v57, %v402_v30  ;;  %v884_v34 = vsub.f32 %v380_v58, %v408_v31  ;;  %666 = vpow2.f32 %v439_v29 }
 0x192   :  { %668 = vpow2.f32 %v433_v32 }
 0x193   :  { %v455_v35 = vmul.f32 1.442695, %v884_v34  ;;  %v449_v38 = vmul.f32 1.442695, %v882_v33 }
 0x194   :  { %v404_v36 = vpop.xlane.xlu1 %403  ;;  %v388_v37 = vpop.xlane.xlu0 %387 }
 0x195   :  { %v888_v39 = vsub.f32 %v370_v63, %v388_v37  ;;  %670 = vpow2.f32 %v455_v35  ;;  %v890_v40 = vsub.f32 %v378_v62, %v404_v36 }
 0x196   :  { %672 = vpow2.f32 %v449_v38 }
 0x197   :  { %v435_v41 = vmul.f32 1.442695, %v888_v39  ;;  %v663_v42 = vpop.eup %662  ;;  %v451_v46 = vmul.f32 1.442695, %v890_v40 }
 0x198   :  { %v398_v43 = vpop.xlane.xlu0 %397  ;;  %v400_v44 = vpop.xlane.xlu1 %399  ;;  %469 = vadd.xlane.f32.xlu0 %v663_v42 }
 0x199   :  { %v893_v45 = vsub.f32 %v375_v2, %v398_v43  ;;  %674 = vpow2.f32 %v435_v41  ;;  %v896_v47 = vsub.f32 %v376_v3, %v400_v44  ;;  %v665_v48 = vpop.eup %664 }
 0x19b   :  { %v445_v49 = vmul.f32 1.442695, %v893_v45  ;;  %v667_v50 = vpop.eup %666  ;;  %v447_v54 = vmul.f32 1.442695, %v896_v47 }
 0x19c   :  { %v394_v51 = vpop.xlane.xlu0 %393  ;;  %v396_v52 = vpop.xlane.xlu1 %395  ;;  %485 = vadd.xlane.f32.xlu0 %v665_v48  ;;  %471 = vadd.xlane.f32.xlu1 %v667_v50 }
 0x19d   :  { %676 = vpow2.f32 %v445_v49  ;;  %v899_v53 = vsub.f32 %v373_v11, %v394_v51  ;;  %v902_v55 = vsub.f32 %v374_v12, %v396_v52  ;;  %v669_v56 = vpop.eup %668 }
 0x19e   :  { %678 = vpow2.f32 %v451_v46 }
 0x19f   :  { %v441_v57 = vmul.f32 1.442695, %v899_v53  ;;  %v671_v58 = vpop.eup %670  ;;  %v443_v62 = vmul.f32 1.442695, %v902_v55 }
 0x1a0   :  { %v410_v59 = vpop.xlane.xlu0 %409  ;;  %v412_v60 = vpop.xlane.xlu1 %411  ;;  %465 = vadd.xlane.f32.xlu0 %v669_v56  ;;  %487 = vadd.xlane.f32.xlu1 %v671_v58 }
 0x1a1   :  { %680 = vpow2.f32 %v441_v57  ;;  %v906_v61 = vsub.f32 %v850_v13, %v410_v59  ;;  %v910_v63 = vsub.f32 %v854_v14, %v412_v60  ;;  %v673_v0 = vpop.eup %672 }
 0x1a2   :  { %682 = vpow2.f32 %v447_v54 }
 0x1a3   :  { %v457_v1 = vmul.f32 1.442695, %v906_v61  ;;  %v675_v2 = vpop.eup %674  ;;  %v459_v6 = vmul.f32 1.442695, %v910_v63 }
 0x1a4   :  { %v414_v3 = vpop.xlane.xlu0 %413  ;;  %v416_v4 = vpop.xlane.xlu1 %415  ;;  %481 = vadd.xlane.f32.xlu0 %v673_v0  ;;  %467 = vadd.xlane.f32.xlu1 %v675_v2 }
 0x1a5   :  { %684 = vpow2.f32 %v457_v1  ;;  %v914_v5 = vsub.f32 %v860_v17, %v414_v3  ;;  %v918_v7 = vsub.f32 %v864_v19, %v416_v4 }
 0x1a6   :  { %686 = vpow2.f32 %v443_v62 }
 0x1a7   :  { %v677_v8 = vpop.eup %676  ;;  %v461_v9 = vmul.f32 1.442695, %v914_v5  ;;  %v463_v11 = vmul.f32 1.442695, %v918_v7 }
 0x1a8   :  { %v679_v10 = vpop.eup %678  ;;  %477 = vadd.xlane.f32.xlu0 %v677_v8 }
 0x1a9   :  { %688 = vpow2.f32 %v461_v9  ;;  %483 = vadd.xlane.f32.xlu1 %v679_v10 }
 0x1aa   :  { %690 = vpow2.f32 %v459_v6 }
 0x1ab   :  { %v681_v12 = vpop.eup %680  ;;  %692 = vpow2.f32 %v463_v11 }
 0x1ac   :  { %v683_v13 = vpop.eup %682  ;;  %473 = vadd.xlane.f32.xlu0 %v681_v12 }
 0x1ad   :  { %479 = vadd.xlane.f32.xlu1 %v683_v13 }
 0x1af   :  { %v685_v14 = vpop.eup %684 }
 0x1b0   :  { %v687_v15 = vpop.eup %686  ;;  %489 = vadd.xlane.f32.xlu0 %v685_v14 }
 0x1b1   :  { %475 = vadd.xlane.f32.xlu1 %v687_v15 }
 0x1b3   :  { %v689_v16 = vpop.eup %688 }
 0x1b4   :  { %v691_v17 = vpop.eup %690  ;;  %493 = vadd.xlane.f32.xlu0 %v689_v16 }
 0x1b5   :  { %491 = vadd.xlane.f32.xlu1 %v691_v17  ;;  %v693_v19 = vpop.eup %692 }
 0x1b9   :  { %495 = vadd.xlane.f32.xlu1 %v693_v19 }
 0x225   :  { %v470_v20 = vpop.xlane.xlu0 %469 }
 0x226   :  { %694 = vlog2.f32 %v470_v20 }
 0x229   :  { %v486_v21 = vpop.xlane.xlu0 %485  ;;  %v472_v24 = vpop.xlane.xlu1 %471 }
 0x22a   :  { %696 = vlog2.f32 %v486_v21 }
 0x22b   :  { %698 = vlog2.f32 %v472_v24 }
 0x22d   :  { %v466_v25 = vpop.xlane.xlu0 %465  ;;  %v488_v26 = vpop.xlane.xlu1 %487 }
 0x22e   :  { %700 = vlog2.f32 %v466_v25 }
 0x22f   :  { %702 = vlog2.f32 %v488_v26 }
 0x230   :  { %v695_v18 = vpop.eup %694 }
 0x231   :  { %v502_v29 = vmul.f32 0.6931472, %v695_v18  ;;  %v482_v30 = vpop.xlane.xlu0 %481  ;;  %v468_v31 = vpop.xlane.xlu1 %467 }
 0x232   :  { %704 = vlog2.f32 %v482_v30 }
 0x233   :  { %v531_v32 = vsub.f32 %v872_v23, %v502_v29  ;;  %706 = vlog2.f32 %v468_v31 }
 0x234   :  { %v697_v35 = vpop.eup %696 }
 0x235   :  { %v699_v36 = vpop.eup %698  ;;  %547 = vst [vmem:[%s989_s3 + $0x10] sm:$0xff] %v531_v32  ;;  %v518_v37 = vmul.f32 0.6931472, %v697_v35  ;;  %v478_v38 = vpop.xlane.xlu0 %477 }
 0x236   :  { %v484_v41 = vpop.xlane.xlu1 %483  ;;  %v504_v42 = vmul.f32 0.6931472, %v699_v36  ;;  %708 = vlog2.f32 %v478_v38 }
 0x237   :  { %v539_v43 = vsub.f32 %v869_v22, %v518_v37  ;;  %710 = vlog2.f32 %v484_v41 }
 0x238   :  { %v701_v44 = vpop.eup %700  ;;  %v532_v46 = vsub.f32 %v878_v28, %v504_v42 }
 0x239   :  { %v703_v48 = vpop.eup %702  ;;  %555 = vst [vmem:[%s989_s3 + $0x50] sm:$0xff] %v539_v43  ;;  %v498_v23 = vmul.f32 0.6931472, %v701_v44  ;;  %v474_v49 = vpop.xlane.xlu0 %473 }
 0x23a   :  { %v480_v50 = vpop.xlane.xlu1 %479  ;;  %548 = vst [vmem:[%s989_s3 + $0x18] sm:$0xff] %v532_v46  ;;  %v520_v51 = vmul.f32 0.6931472, %v703_v48  ;;  %712 = vlog2.f32 %v474_v49 }
 0x23b   :  { %v529_v22 = vsub.f32 %v876_v27, %v498_v23  ;;  %714 = vlog2.f32 %v480_v50 }
 0x23c   :  { %v705_v52 = vpop.eup %704  ;;  %v540_v28 = vsub.f32 %v884_v34, %v520_v51 }
 0x23d   :  { %v707_v54 = vpop.eup %706  ;;  %545 = vst [vmem:[%s989_s3] sm:$0xff] %v529_v22  ;;  %v514_v56 = vmul.f32 0.6931472, %v705_v52  ;;  %v490_v57 = vpop.xlane.xlu0 %489 }
 0x23e   :  { %v476_v58 = vpop.xlane.xlu1 %475  ;;  %556 = vst [vmem:[%s989_s3 + $0x58] sm:$0xff] %v540_v28  ;;  %v500_v59 = vmul.f32 0.6931472, %v707_v54  ;;  %716 = vlog2.f32 %v490_v57 }
 0x23f   :  { %v537_v27 = vsub.f32 %v882_v33, %v514_v56  ;;  %718 = vlog2.f32 %v476_v58 }
 0x240   :  { %v709_v60 = vpop.eup %708  ;;  %v530_v34 = vsub.f32 %v888_v39, %v500_v59 }
 0x241   :  { %v711_v62 = vpop.eup %710  ;;  %553 = vst [vmem:[%s989_s3 + $0x40] sm:$0xff] %v537_v27  ;;  %v510_v0 = vmul.f32 0.6931472, %v709_v60  ;;  %v494_v1 = vpop.xlane.xlu0 %493 }
 0x242   :  { %v492_v2 = vpop.xlane.xlu1 %491  ;;  %546 = vst [vmem:[%s989_s3 + $0x8] sm:$0xff] %v530_v34  ;;  %v516_v3 = vmul.f32 0.6931472, %v711_v62  ;;  %720 = vlog2.f32 %v494_v1 }
 0x243   :  { %v535_v33 = vsub.f32 %v893_v45, %v510_v0  ;;  %722 = vlog2.f32 %v492_v2 }
 0x244   :  { %v713_v4 = vpop.eup %712  ;;  %v538_v39 = vsub.f32 %v890_v40, %v516_v3 }
 0x245   :  { %v715_v6 = vpop.eup %714  ;;  %551 = vst [vmem:[%s989_s3 + $0x30] sm:$0xff] %v535_v33  ;;  %v506_v8 = vmul.f32 0.6931472, %v713_v4 }
 0x246   :  { %v496_v9 = vpop.xlane.xlu1 %495  ;;  %554 = vst [vmem:[%s989_s3 + $0x48] sm:$0xff] %v538_v39  ;;  %v512_v10 = vmul.f32 0.6931472, %v715_v6 }
 0x247   :  { %724 = vlog2.f32 %v496_v9  ;;  %v533_v11 = vsub.f32 %v899_v53, %v506_v8 }
 0x248   :  { %v717_v45 = vpop.eup %716  ;;  %v536_v12 = vsub.f32 %v896_v47, %v512_v10 }
 0x249   :  { %v719_v13 = vpop.eup %718  ;;  %549 = vst [vmem:[%s989_s3 + $0x20] sm:$0xff] %v533_v11  ;;  %v522_v40 = vmul.f32 0.6931472, %v717_v45 }
 0x24a   :  { %552 = vst [vmem:[%s989_s3 + $0x38] sm:$0xff] %v536_v12  ;;  %v508_v14 = vmul.f32 0.6931472, %v719_v13 }
 0x24b   :  { %v541_v15 = vsub.f32 %v906_v61, %v522_v40 }
 0x24c   :  { %v721_v16 = vpop.eup %720  ;;  %v534_v17 = vsub.f32 %v902_v55, %v508_v14 }
 0x24d   :  { %v723_v53 = vpop.eup %722  ;;  %557 = vst [vmem:[%s989_s3 + $0x60] sm:$0xff] %v541_v15  ;;  %v526_v47 = vmul.f32 0.6931472, %v721_v16 }
 0x24e   :  { %550 = vst [vmem:[%s989_s3 + $0x28] sm:$0xff] %v534_v17  ;;  %v524_v19 = vmul.f32 0.6931472, %v723_v53 }
 0x24f   :  { %v543_v20 = vsub.f32 %v914_v5, %v526_v47 }
 0x250   :  { %v542_v24 = vsub.f32 %v910_v63, %v524_v19 }
 0x251   :  { %v725_v21 = vpop.eup %724  ;;  %559 = vst [vmem:[%s989_s3 + $0x70] sm:$0xff] %v543_v20 }
 0x252   :  { %v528_v55 = vmul.f32 0.6931472, %v725_v21  ;;  %558 = vst [vmem:[%s989_s3 + $0x68] sm:$0xff] %v542_v24 }
 0x254   :  { %v544_v61 = vsub.f32 %v918_v7, %v528_v55 }
 0x256   :  { %560 = vst [vmem:[%s989_s3 + $0x78] sm:$0xff] %v544_v61 }

</bundles_post_ra>
